<compile_context>
chip_gen: v7x
topology: tpu7x:2x2x1
jax: 0.10.0
libtpu: 0.0.40
codegen_flags: <defaults>
</compile_context>

<pallas_src>
import numpy as np
import jax
import jax.numpy as jnp
from jax.experimental import pallas as pl
from jax.experimental.pallas import tpu as pltpu

# ----------------------------------------------------------------------------
# Synthetic "FLAGS" / data-derived sizes (small, deterministic).
# ----------------------------------------------------------------------------
F_DIM = 8                        # columns of the time-series DataFrame
T_STEPS = 9                      # padded rows per sample (last row = "recent values")
T_MAX_HIST = T_STEPS - 1         # max history length (statically unrolled)
LSTM_HID = 20                    # LSTMEncoder(self.X[0].shape[1], 20)
REDUCED_DIM = 20                 # FLAGS.reduced_dim (empty-history zero embedding)
HIDDEN1 = 64                     # FLAGS.hidden_dim1
HIDDEN2 = 32                     # FLAGS.hidden_dim2
NUM_CLASSES = 4                  # len(np.unique(self.y))
FEATURES_TOTAL = F_DIM + LSTM_HID  # map_features_to_indices for DataFrame inputs

assert REDUCED_DIM == LSTM_HID, "reduced_dim must equal the LSTM hidden size"

# ---- packed weight slab layout (row offsets, all 8-row aligned) -------------
OFF_WIH = 0                                  # (F_DIM, 4H)   g-gate cols pre-scaled x2
OFF_WHH = 8                                  # (H, 4H)       g-gate cols pre-scaled x2
OFF_W1H = 32                                 # (H, HIDDEN1)  layer1 rows for LSTM embed
OFF_W1R = 56                                 # (F, HIDDEN1)  layer1 rows for recent vals
OFF_W2 = 64                                  # (HIDDEN1, HIDDEN2)
OFF_W3 = 128                                 # (HIDDEN2, HIDDEN2)
OFF_WL = 160                                 # (HIDDEN2, NUM_CLASSES)
W_ROWS = 192

# ---- packed bias slab layout -------------------------------------------------
ROW_BLSTM, ROW_B1, ROW_B2, ROW_B3, ROW_BL, ROW_A1, ROW_A2, ROW_A3 = range(8)
B_ROWS = 8


# ----------------------------------------------------------------------------
# Fused kernel: LSTM encoder -> mask -> Linear+PReLU x3 -> Linear -> softmax
# ----------------------------------------------------------------------------
def _fused_kernel(lens_ref, x_ref, mask_ref, w_ref, b_ref, probs_ref):
    """lens_ref: SMEM (B,) int32 history length per sample (scalar prefetch)
    x_ref:    (1, T_STEPS, F)  per-sample padded time series (last row = recent)
    mask_ref: (1, 1, FEATURES_TOTAL)
    w_ref:    (W_ROWS, 128)    packed weight slab (VMEM-resident across grid)
    b_ref:    (B_ROWS, 128)    packed biases + lane-broadcast PReLU alphas
    probs_ref:(1, 1, NUM_CLASSES)
    """
    f32 = jnp.float32
    H = LSTM_HID
    b = pl.program_id(0)
    n_hist = lens_ref[b]                                  # runtime history length

    x = x_ref[0]                                          # (T_STEPS, F)
    hist = x[:T_MAX_HIST, :]                              # (T_MAX, F)
    recent = x[T_MAX_HIST:T_STEPS, :]                     # (1, F)

    # ---------------- LSTM encoder (final hidden state) ----------------------
    w_ih = w_ref[OFF_WIH:OFF_WIH + F_DIM, :4 * H]         # (F, 4H)
    w_hh = w_ref[OFF_WHH:OFF_WHH + H, :4 * H]             # (H, 4H)
    b_lstm = b_ref[ROW_BLSTM:ROW_BLSTM + 1, :4 * H]       # (1, 4H)

    # Hoisted input projection: one matmul + one bias add for all steps/gates.
    gx = jnp.dot(hist, w_ih, preferred_element_type=f32) + b_lstm   # (T_MAX, 4H)

    h = jnp.zeros((1, H), f32)
    c = jnp.zeros((1, H), f32)
    # Statically unrolled; dead steps (t >= n_hist) are masked out, so the same
    # compiled kernel serves every history length (0..T_MAX).
    for t in range(T_MAX_HIST):
        pre = gx[t:t + 1, :] + jnp.dot(h, w_hh, preferred_element_type=f32)  # (1, 4H)
        sg = jax.nn.sigmoid(pre)                          # one EUP push for all gates
        i_g = sg[:, 0:H]
        f_g = sg[:, H:2 * H]
        g_g = 2.0 * sg[:, 2 * H:3 * H] - 1.0              # == tanh (x2 folded into weights)
        o_g = sg[:, 3 * H:4 * H]
        c_new = f_g * c + i_g * g_g
        h_new = o_g * jnp.tanh(c_new)
        live = t < n_hist
        c = jnp.where(live, c_new, c)
        h = jnp.where(live, h_new, h)
    # n_hist == 0 -> h stays zeros == zeros(1, REDUCED_DIM) empty-history embedding.

    # ---------------- classifier head ----------------------------------------
    mask_v = mask_ref[0]                                  # (1, FEATURES_TOTAL)
    hm = h * mask_v[:, :H]                                # (1, H)
    rm = recent * mask_v[:, H:]                           # (1, F)

    def prelu(v, a_row):                                  # a_row: lane-broadcast alpha
        return jnp.maximum(v, 0.0) + a_row * jnp.minimum(v, 0.0)

    # split-w1 matmul == concat([ts_embed, recent]) @ w1
    h1 = prelu(jnp.dot(hm, w_ref[OFF_W1H:OFF_W1H + H, :HIDDEN1],
                       preferred_element_type=f32)
               + jnp.dot(rm, w_ref[OFF_W1R:OFF_W1R + F_DIM, :HIDDEN1],
                         preferred_element_type=f32)
               + b_ref[ROW_B1:ROW_B1 + 1, :HIDDEN1],
               b_ref[ROW_A1:ROW_A1 + 1, :HIDDEN1])
    h2 = prelu(jnp.dot(h1, w_ref[OFF_W2:OFF_W2 + HIDDEN1, :HIDDEN2],
                       preferred_element_type=f32)
               + b_ref[ROW_B2:ROW_B2 + 1, :HIDDEN2],
               b_ref[ROW_A2:ROW_A2 + 1, :HIDDEN2])
    h3 = prelu(jnp.dot(h2, w_ref[OFF_W3:OFF_W3 + HIDDEN2, :HIDDEN2],
                       preferred_element_type=f32)
               + b_ref[ROW_B3:ROW_B3 + 1, :HIDDEN2],
               b_ref[ROW_A3:ROW_A3 + 1, :HIDDEN2])
    logits = (jnp.dot(h3, w_ref[OFF_WL:OFF_WL + HIDDEN2, :NUM_CLASSES],
                      preferred_element_type=f32)
              + b_ref[ROW_BL:ROW_BL + 1, :NUM_CLASSES])   # (1, C)
    m = jnp.max(logits, axis=-1, keepdims=True)
    e = jnp.exp(logits - m)
    probs_ref[0] = e / jnp.sum(e, axis=-1, keepdims=True)


# ----------------------------------------------------------------------------
# Parameter initialization (deterministic, synthetic) + one-time slab packing
# ----------------------------------------------------------------------------
def init_params(key):
    ks = jax.random.split(key, 12)
    s = 0.1
    H = LSTM_HID
    p = {
        # LSTMEncoder (canonical layout, transposed vs. PyTorch: (in, 4H), gates i,f,g,o)
        "w_ih": jax.random.normal(ks[0], (F_DIM, 4 * H), jnp.float32) * s,
        "w_hh": jax.random.normal(ks[1], (H, 4 * H), jnp.float32) * s,
        "b_lstm": jax.random.normal(ks[2], (1, 4 * H), jnp.float32) * s,  # b_ih + b_hh
        # classifier layers (Linear weights transposed: (in, out))
        "w1": jax.random.normal(ks[3], (FEATURES_TOTAL, HIDDEN1), jnp.float32) * s,
        "b1": jax.random.normal(ks[4], (1, HIDDEN1), jnp.float32) * s,
        "w2": jax.random.normal(ks[5], (HIDDEN1, HIDDEN2), jnp.float32) * s,
        "b2": jax.random.normal(ks[6], (1, HIDDEN2), jnp.float32) * s,
        "w3": jax.random.normal(ks[7], (HIDDEN2, HIDDEN2), jnp.float32) * s,
        "b3": jax.random.normal(ks[8], (1, HIDDEN2), jnp.float32) * s,
        "wl": jax.random.normal(ks[9], (HIDDEN2, NUM_CLASSES), jnp.float32) * s,
        "bl": jax.random.normal(ks[10], (1, NUM_CLASSES), jnp.float32) * s,
        # PReLU weights (PyTorch default init 0.25, one scalar per PReLU)
        "alphas": jnp.full((3,), 0.25, jnp.float32),
    }

    # ---- pack everything into two zero-padded slabs (done ONCE at init) ----
    # x2 folded into the g-gate columns so one fused sigmoid + (2*sigma-1) == tanh.
    scale = np.ones((4 * H,), np.float32)
    scale[2 * H:3 * H] = 2.0

    w_slab = np.zeros((W_ROWS, 128), np.float32)
    w_slab[OFF_WIH:OFF_WIH + F_DIM, :4 * H] = np.asarray(p["w_ih"]) * scale
    w_slab[OFF_WHH:OFF_WHH + H, :4 * H] = np.asarray(p["w_hh"]) * scale
    w1 = np.asarray(p["w1"])
    w_slab[OFF_W1H:OFF_W1H + H, :HIDDEN1] = w1[:H]
    w_slab[OFF_W1R:OFF_W1R + F_DIM, :HIDDEN1] = w1[H:]
    w_slab[OFF_W2:OFF_W2 + HIDDEN1, :HIDDEN2] = np.asarray(p["w2"])
    w_slab[OFF_W3:OFF_W3 + HIDDEN2, :HIDDEN2] = np.asarray(p["w3"])
    w_slab[OFF_WL:OFF_WL + HIDDEN2, :NUM_CLASSES] = np.asarray(p["wl"])

    b_slab = np.zeros((B_ROWS, 128), np.float32)
    b_slab[ROW_BLSTM, :4 * H] = np.asarray(p["b_lstm"])[0] * scale
    b_slab[ROW_B1, :HIDDEN1] = np.asarray(p["b1"])[0]
    b_slab[ROW_B2, :HIDDEN2] = np.asarray(p["b2"])[0]
    b_slab[ROW_B3, :HIDDEN2] = np.asarray(p["b3"])[0]
    b_slab[ROW_BL, :NUM_CLASSES] = np.asarray(p["bl"])[0]
    alphas = np.asarray(p["alphas"])
    b_slab[ROW_A1, :] = alphas[0]                 # lane-broadcast PReLU slopes
    b_slab[ROW_A2, :] = alphas[1]
    b_slab[ROW_A3, :] = alphas[2]

    p["w_slab"] = jnp.asarray(w_slab)
    p["b_slab"] = jnp.asarray(b_slab)
    return p


# ----------------------------------------------------------------------------
# MultimodalGuesser.forward -- time-series branch, batched single pallas_call
# ----------------------------------------------------------------------------
def multimodal_guesser_forward(params, ts_batch, hist_lens, mask=None):
    """ts_batch: (B, T_STEPS, F_DIM), rows [0:hist_lens[b]] = history, last row =
    recent values (remaining rows are padding).  hist_lens: (B,) int32.
    mask: None or broadcastable to (B, FEATURES_TOTAL).  Returns (B, NUM_CLASSES)."""
    batch = ts_batch.shape[0]
    if mask is None:
        mask_arr = jnp.ones((batch, 1, FEATURES_TOTAL), jnp.float32)
    else:
        mask_arr = jnp.broadcast_to(jnp.asarray(mask, jnp.float32),
                                    (batch, FEATURES_TOTAL)).reshape(
                                        batch, 1, FEATURES_TOTAL)

    grid_spec = pltpu.PrefetchScalarGridSpec(
        num_scalar_prefetch=1,                    # hist_lens -> SMEM
        grid=(batch,),
        in_specs=[
            pl.BlockSpec((1, T_STEPS, F_DIM), lambda b, lens: (b, 0, 0)),
            pl.BlockSpec((1, 1, FEATURES_TOTAL), lambda b, lens: (b, 0, 0)),
            pl.BlockSpec((W_ROWS, 128), lambda b, lens: (0, 0)),   # VMEM-resident weights
            pl.BlockSpec((B_ROWS, 128), lambda b, lens: (0, 0)),   # biases + alphas
        ],
        out_specs=pl.BlockSpec((1, 1, NUM_CLASSES), lambda b, lens: (b, 0, 0)),
    )
    out = pl.pallas_call(
        _fused_kernel,
        out_shape=jax.ShapeDtypeStruct((batch, 1, NUM_CLASSES), jnp.float32),
        grid_spec=grid_spec,
        compiler_params=pltpu.CompilerParams(
            dimension_semantics=("parallel",)),   # samples shard across TCs on v7x
    )(hist_lens.astype(jnp.int32), ts_batch.astype(jnp.float32), mask_arr,
      params["w_slab"], params["b_slab"])
    return out[:, 0, :]                           # (B, NUM_CLASSES)


# ----------------------------------------------------------------------------
# Pure-JAX reference for validation (canonical weight layout, per sample)
# ----------------------------------------------------------------------------
def forward_ref(params, ts_sample, mask=None):
    H = LSTM_HID
    history = ts_sample[:-1]

    def step(carry, x_t):
        h, c = carry
        gates = x_t[None, :] @ params["w_ih"] + h @ params["w_hh"] + params["b_lstm"]
        i = jax.nn.sigmoid(gates[:, :H])
        f = jax.nn.sigmoid(gates[:, H:2 * H])
        g = jnp.tanh(gates[:, 2 * H:3 * H])
        o = jax.nn.sigmoid(gates[:, 3 * H:])
        c = f * c + i * g
        h = o * jnp.tanh(c)
        return (h, c), None

    if history.shape[0] > 0:
        (h, _), _ = jax.lax.scan(step, (jnp.zeros((1, H)), jnp.zeros((1, H))), history)
    else:
        h = jnp.zeros((1, REDUCED_DIM), jnp.float32)
    x = jnp.concatenate([h, ts_sample[-1:]], axis=1)
    if mask is not None:
        x = x * jnp.broadcast_to(jnp.asarray(mask, x.dtype), x.shape)

    def prelu(v, a):
        return jnp.maximum(v, 0.0) + a * jnp.minimum(v, 0.0)

    a = params["alphas"]
    h1 = prelu(x @ params["w1"] + params["b1"], a[0])
    h2 = prelu(h1 @ params["w2"] + params["b2"], a[1])
    h3 = prelu(h2 @ params["w3"] + params["b3"], a[2])
    logits = h3 @ params["wl"] + params["bl"]
    return jax.nn.softmax(logits, axis=1)


# ----------------------------------------------------------------------------
if __name__ == "__main__":
    key = jax.random.PRNGKey(0)
    k_ts, k_mask, k_params = jax.random.split(key, 3)
    params = init_params(k_params)

    B = 2
    # padded batch of time-series samples (stand-in for pandas DataFrames);
    # row T_STEPS-1 of each sample = recent values, rows [0:len) = history
    ts_batch = jax.random.normal(k_ts, (B, T_STEPS, F_DIM), dtype=jnp.float32)
    hist_lens = jnp.array([T_MAX_HIST, 5], jnp.int32)     # full and partial history
    mask = (jax.random.uniform(k_mask, (B, FEATURES_TOTAL)) > 0.2).astype(jnp.float32)

    probs = jax.block_until_ready(
        multimodal_guesser_forward(params, ts_batch, hist_lens, mask))
    assert probs.shape == (B, NUM_CLASSES)

    for i in range(B):
        t = int(hist_lens[i])
        sample = jnp.concatenate(
            [ts_batch[i, :t], ts_batch[i, T_MAX_HIST:T_STEPS]], axis=0)
        ref = forward_ref(params, sample, mask[i:i + 1])
        np.testing.assert_allclose(np.asarray(probs[i:i + 1]), np.asarray(ref),
                                   rtol=1e-3, atol=1e-3)
        assert abs(float(jnp.sum(probs[i])) - 1.0) < 1e-4

    # empty-history (zero embedding) path + mask=None path, same compiled kernel
    hist_lens2 = jnp.array([0, T_MAX_HIST], jnp.int32)
    probs2 = jax.block_until_ready(
        multimodal_guesser_forward(params, ts_batch, hist_lens2, None))
    for i in range(B):
        t = int(hist_lens2[i])
        sample = jnp.concatenate(
            [ts_batch[i, :t], ts_batch[i, T_MAX_HIST:T_STEPS]], axis=0)
        ref = forward_ref(params, sample, None)
        np.testing.assert_allclose(np.asarray(probs2[i:i + 1]), np.asarray(ref),
                                   rtol=1e-3, atol=1e-3)

    print("KERNEL_OK")
</pallas_src>

<mosaic_0001>
module attributes {stable_mosaic.version = 11 : i64} {
  func.func @_fused_kernel(%arg0: i32, %arg1: memref<2xi32, #tpu.memory_space<smem>>, %arg2: memref<1x9x8xf32, #tpu.memory_space<vmem>>, %arg3: memref<1x1x28xf32, #tpu.memory_space<vmem>>, %arg4: memref<192x128xf32, #tpu.memory_space<vmem>>, %arg5: memref<8x128xf32, #tpu.memory_space<vmem>>, %arg6: memref<1x1x4xf32, #tpu.memory_space<vmem>>) attributes {dimension_semantics = [#tpu.dimension_semantics<parallel>], iteration_bounds = array<i64: 2>, scalar_prefetch = 1 : i64, scratch_operands = 0 : i64, tpu.core_type = #tpu.core_type<tc>, window_params = [{transform_indices = @transform_0, window_bounds = array<i64: 1, 9, 8>}, {transform_indices = @transform_1, window_bounds = array<i64: 1, 1, 28>}, {pipeline_mode = #tpu.pipeline_mode<synchronous>, transform_indices = @transform_2, window_bounds = array<i64: 192, 128>}, {pipeline_mode = #tpu.pipeline_mode<synchronous>, transform_indices = @transform_3, window_bounds = array<i64: 8, 128>}, {transform_indices = @transform_4, window_bounds = array<i64: 1, 1, 4>}]} {
    %0 = arith.index_cast %arg0 : i32 to index
    %1 = memref.load %arg1[%0] : memref<2xi32, #tpu.memory_space<smem>>
    %c0 = arith.constant 0 : index
    %c0_0 = arith.constant 0 : index
    %c0_1 = arith.constant 0 : index
    %2 = vector.load %arg2[%c0, %c0_0, %c0_1] : memref<1x9x8xf32, #tpu.memory_space<vmem>>, vector<1x9x8xf32>
    %3 = vector.shape_cast %2 : vector<1x9x8xf32> to vector<9x8xf32>
    %4 = vector.extract_strided_slice %3 {offsets = [0, 0], sizes = [8, 8], strides = [1, 1]} : vector<9x8xf32> to vector<8x8xf32>
    %5 = vector.extract_strided_slice %3 {offsets = [8, 0], sizes = [1, 8], strides = [1, 1]} : vector<9x8xf32> to vector<1x8xf32>
    %c0_2 = arith.constant 0 : index
    %c0_3 = arith.constant 0 : index
    %6 = vector.load %arg4[%c0_2, %c0_3] : memref<192x128xf32, #tpu.memory_space<vmem>>, vector<8x80xf32>
    %c8 = arith.constant 8 : index
    %c0_4 = arith.constant 0 : index
    %7 = vector.load %arg4[%c8, %c0_4] : memref<192x128xf32, #tpu.memory_space<vmem>>, vector<20x80xf32>
    %c0_5 = arith.constant 0 : index
    %c0_6 = arith.constant 0 : index
    %8 = vector.load %arg5[%c0_5, %c0_6] : memref<8x128xf32, #tpu.memory_space<vmem>>, vector<1x80xf32>
    %cst = arith.constant dense<0.000000e+00> : vector<8x80xf32>
    %9 = tpu.matmul %4, %6, %cst {dimension_numbers = #tpu.dot_dimension_numbers<[1], [0], [0], [1], [0, 0, 1, 1], [], []>} : vector<8x8xf32>, vector<8x80xf32>, vector<8x80xf32> -> vector<8x80xf32>
    %10 = vector.broadcast %8 : vector<1x80xf32> to vector<8x80xf32>
    %11 = arith.addf %9, %10 : vector<8x80xf32>
    %cst_7 = arith.constant 0.000000e+00 : f32
    %12 = vector.broadcast %cst_7 : f32 to vector<1x20xf32>
    %cst_8 = arith.constant 0.000000e+00 : f32
    %13 = vector.broadcast %cst_8 : f32 to vector<1x20xf32>
    %14 = vector.extract_strided_slice %11 {offsets = [0, 0], sizes = [1, 80], strides = [1, 1]} : vector<8x80xf32> to vector<1x80xf32>
    %cst_9 = arith.constant dense<0.000000e+00> : vector<1x80xf32>
    %15 = tpu.matmul %12, %7, %cst_9 {dimension_numbers = #tpu.dot_dimension_numbers<[1], [0], [0], [1], [0, 0, 1, 1], [], []>} : vector<1x20xf32>, vector<20x80xf32>, vector<1x80xf32> -> vector<1x80xf32>
    %16 = arith.addf %14, %15 : vector<1x80xf32>
    %17 = arith.negf %16 : vector<1x80xf32>
    %18 = math.exp %17 : vector<1x80xf32>
    %cst_10 = arith.constant 1.000000e+00 : f32
    %19 = vector.broadcast %cst_10 : f32 to vector<1x80xf32>
    %20 = arith.addf %19, %18 : vector<1x80xf32>
    %21 = arith.divf %19, %20 : vector<1x80xf32>
    %22 = vector.extract_strided_slice %21 {offsets = [0, 0], sizes = [1, 20], strides = [1, 1]} : vector<1x80xf32> to vector<1x20xf32>
    %23 = vector.extract_strided_slice %21 {offsets = [0, 20], sizes = [1, 20], strides = [1, 1]} : vector<1x80xf32> to vector<1x20xf32>
    %24 = vector.extract_strided_slice %21 {offsets = [0, 40], sizes = [1, 20], strides = [1, 1]} : vector<1x80xf32> to vector<1x20xf32>
    %cst_11 = arith.constant 2.000000e+00 : f32
    %25 = vector.broadcast %cst_11 : f32 to vector<1x20xf32>
    %26 = arith.mulf %25, %24 : vector<1x20xf32>
    %cst_12 = arith.constant 1.000000e+00 : f32
    %27 = vector.broadcast %cst_12 : f32 to vector<1x20xf32>
    %28 = arith.subf %26, %27 : vector<1x20xf32>
    %29 = vector.extract_strided_slice %21 {offsets = [0, 60], sizes = [1, 20], strides = [1, 1]} : vector<1x80xf32> to vector<1x20xf32>
    %30 = arith.mulf %23, %13 : vector<1x20xf32>
    %31 = arith.mulf %22, %28 : vector<1x20xf32>
    %32 = arith.addf %30, %31 : vector<1x20xf32>
    %33 = math.tanh %32 : vector<1x20xf32>
    %34 = arith.mulf %29, %33 : vector<1x20xf32>
    %c0_i32 = arith.constant 0 : i32
    %35 = arith.cmpi sgt, %1, %c0_i32 : i32
    %36 = arith.select %35, %32, %13 : vector<1x20xf32>
    %37 = arith.select %35, %34, %12 : vector<1x20xf32>
    %38 = vector.extract_strided_slice %11 {offsets = [1, 0], sizes = [1, 80], strides = [1, 1]} : vector<8x80xf32> to vector<1x80xf32>
    %cst_13 = arith.constant dense<0.000000e+00> : vector<1x80xf32>
    %39 = tpu.matmul %37, %7, %cst_13 {dimension_numbers = #tpu.dot_dimension_numbers<[1], [0], [0], [1], [0, 0, 1, 1], [], []>} : vector<1x20xf32>, vector<20x80xf32>, vector<1x80xf32> -> vector<1x80xf32>
    %40 = arith.addf %38, %39 : vector<1x80xf32>
    %41 = arith.negf %40 : vector<1x80xf32>
    %42 = math.exp %41 : vector<1x80xf32>
    %cst_14 = arith.constant 1.000000e+00 : f32
    %43 = vector.broadcast %cst_14 : f32 to vector<1x80xf32>
    %44 = arith.addf %43, %42 : vector<1x80xf32>
    %45 = arith.divf %43, %44 : vector<1x80xf32>
    %46 = vector.extract_strided_slice %45 {offsets = [0, 0], sizes = [1, 20], strides = [1, 1]} : vector<1x80xf32> to vector<1x20xf32>
    %47 = vector.extract_strided_slice %45 {offsets = [0, 20], sizes = [1, 20], strides = [1, 1]} : vector<1x80xf32> to vector<1x20xf32>
    %48 = vector.extract_strided_slice %45 {offsets = [0, 40], sizes = [1, 20], strides = [1, 1]} : vector<1x80xf32> to vector<1x20xf32>
    %cst_15 = arith.constant 2.000000e+00 : f32
    %49 = vector.broadcast %cst_15 : f32 to vector<1x20xf32>
    %50 = arith.mulf %49, %48 : vector<1x20xf32>
    %cst_16 = arith.constant 1.000000e+00 : f32
    %51 = vector.broadcast %cst_16 : f32 to vector<1x20xf32>
    %52 = arith.subf %50, %51 : vector<1x20xf32>
    %53 = vector.extract_strided_slice %45 {offsets = [0, 60], sizes = [1, 20], strides = [1, 1]} : vector<1x80xf32> to vector<1x20xf32>
    %54 = arith.mulf %47, %36 : vector<1x20xf32>
    %55 = arith.mulf %46, %52 : vector<1x20xf32>
    %56 = arith.addf %54, %55 : vector<1x20xf32>
    %57 = math.tanh %56 : vector<1x20xf32>
    %58 = arith.mulf %53, %57 : vector<1x20xf32>
    %c1_i32 = arith.constant 1 : i32
    %59 = arith.cmpi sgt, %1, %c1_i32 : i32
    %60 = arith.select %59, %56, %36 : vector<1x20xf32>
    %61 = arith.select %59, %58, %37 : vector<1x20xf32>
    %62 = vector.extract_strided_slice %11 {offsets = [2, 0], sizes = [1, 80], strides = [1, 1]} : vector<8x80xf32> to vector<1x80xf32>
    %cst_17 = arith.constant dense<0.000000e+00> : vector<1x80xf32>
    %63 = tpu.matmul %61, %7, %cst_17 {dimension_numbers = #tpu.dot_dimension_numbers<[1], [0], [0], [1], [0, 0, 1, 1], [], []>} : vector<1x20xf32>, vector<20x80xf32>, vector<1x80xf32> -> vector<1x80xf32>
    %64 = arith.addf %62, %63 : vector<1x80xf32>
    %65 = arith.negf %64 : vector<1x80xf32>
    %66 = math.exp %65 : vector<1x80xf32>
    %cst_18 = arith.constant 1.000000e+00 : f32
    %67 = vector.broadcast %cst_18 : f32 to vector<1x80xf32>
    %68 = arith.addf %67, %66 : vector<1x80xf32>
    %69 = arith.divf %67, %68 : vector<1x80xf32>
    %70 = vector.extract_strided_slice %69 {offsets = [0, 0], sizes = [1, 20], strides = [1, 1]} : vector<1x80xf32> to vector<1x20xf32>
    %71 = vector.extract_strided_slice %69 {offsets = [0, 20], sizes = [1, 20], strides = [1, 1]} : vector<1x80xf32> to vector<1x20xf32>
    %72 = vector.extract_strided_slice %69 {offsets = [0, 40], sizes = [1, 20], strides = [1, 1]} : vector<1x80xf32> to vector<1x20xf32>
    %cst_19 = arith.constant 2.000000e+00 : f32
    %73 = vector.broadcast %cst_19 : f32 to vector<1x20xf32>
    %74 = arith.mulf %73, %72 : vector<1x20xf32>
    %cst_20 = arith.constant 1.000000e+00 : f32
    %75 = vector.broadcast %cst_20 : f32 to vector<1x20xf32>
    %76 = arith.subf %74, %75 : vector<1x20xf32>
    %77 = vector.extract_strided_slice %69 {offsets = [0, 60], sizes = [1, 20], strides = [1, 1]} : vector<1x80xf32> to vector<1x20xf32>
    %78 = arith.mulf %71, %60 : vector<1x20xf32>
    %79 = arith.mulf %70, %76 : vector<1x20xf32>
    %80 = arith.addf %78, %79 : vector<1x20xf32>
    %81 = math.tanh %80 : vector<1x20xf32>
    %82 = arith.mulf %77, %81 : vector<1x20xf32>
    %c2_i32 = arith.constant 2 : i32
    %83 = arith.cmpi sgt, %1, %c2_i32 : i32
    %84 = arith.select %83, %80, %60 : vector<1x20xf32>
    %85 = arith.select %83, %82, %61 : vector<1x20xf32>
    %86 = vector.extract_strided_slice %11 {offsets = [3, 0], sizes = [1, 80], strides = [1, 1]} : vector<8x80xf32> to vector<1x80xf32>
    %cst_21 = arith.constant dense<0.000000e+00> : vector<1x80xf32>
    %87 = tpu.matmul %85, %7, %cst_21 {dimension_numbers = #tpu.dot_dimension_numbers<[1], [0], [0], [1], [0, 0, 1, 1], [], []>} : vector<1x20xf32>, vector<20x80xf32>, vector<1x80xf32> -> vector<1x80xf32>
    %88 = arith.addf %86, %87 : vector<1x80xf32>
    %89 = arith.negf %88 : vector<1x80xf32>
    %90 = math.exp %89 : vector<1x80xf32>
    %cst_22 = arith.constant 1.000000e+00 : f32
    %91 = vector.broadcast %cst_22 : f32 to vector<1x80xf32>
    %92 = arith.addf %91, %90 : vector<1x80xf32>
    %93 = arith.divf %91, %92 : vector<1x80xf32>
    %94 = vector.extract_strided_slice %93 {offsets = [0, 0], sizes = [1, 20], strides = [1, 1]} : vector<1x80xf32> to vector<1x20xf32>
    %95 = vector.extract_strided_slice %93 {offsets = [0, 20], sizes = [1, 20], strides = [1, 1]} : vector<1x80xf32> to vector<1x20xf32>
    %96 = vector.extract_strided_slice %93 {offsets = [0, 40], sizes = [1, 20], strides = [1, 1]} : vector<1x80xf32> to vector<1x20xf32>
    %cst_23 = arith.constant 2.000000e+00 : f32
    %97 = vector.broadcast %cst_23 : f32 to vector<1x20xf32>
    %98 = arith.mulf %97, %96 : vector<1x20xf32>
    %cst_24 = arith.constant 1.000000e+00 : f32
    %99 = vector.broadcast %cst_24 : f32 to vector<1x20xf32>
    %100 = arith.subf %98, %99 : vector<1x20xf32>
    %101 = vector.extract_strided_slice %93 {offsets = [0, 60], sizes = [1, 20], strides = [1, 1]} : vector<1x80xf32> to vector<1x20xf32>
    %102 = arith.mulf %95, %84 : vector<1x20xf32>
    %103 = arith.mulf %94, %100 : vector<1x20xf32>
    %104 = arith.addf %102, %103 : vector<1x20xf32>
    %105 = math.tanh %104 : vector<1x20xf32>
    %106 = arith.mulf %101, %105 : vector<1x20xf32>
    %c3_i32 = arith.constant 3 : i32
    %107 = arith.cmpi sgt, %1, %c3_i32 : i32
    %108 = arith.select %107, %104, %84 : vector<1x20xf32>
    %109 = arith.select %107, %106, %85 : vector<1x20xf32>
    %110 = vector.extract_strided_slice %11 {offsets = [4, 0], sizes = [1, 80], strides = [1, 1]} : vector<8x80xf32> to vector<1x80xf32>
    %cst_25 = arith.constant dense<0.000000e+00> : vector<1x80xf32>
    %111 = tpu.matmul %109, %7, %cst_25 {dimension_numbers = #tpu.dot_dimension_numbers<[1], [0], [0], [1], [0, 0, 1, 1], [], []>} : vector<1x20xf32>, vector<20x80xf32>, vector<1x80xf32> -> vector<1x80xf32>
    %112 = arith.addf %110, %111 : vector<1x80xf32>
    %113 = arith.negf %112 : vector<1x80xf32>
    %114 = math.exp %113 : vector<1x80xf32>
    %cst_26 = arith.constant 1.000000e+00 : f32
    %115 = vector.broadcast %cst_26 : f32 to vector<1x80xf32>
    %116 = arith.addf %115, %114 : vector<1x80xf32>
    %117 = arith.divf %115, %116 : vector<1x80xf32>
    %118 = vector.extract_strided_slice %117 {offsets = [0, 0], sizes = [1, 20], strides = [1, 1]} : vector<1x80xf32> to vector<1x20xf32>
    %119 = vector.extract_strided_slice %117 {offsets = [0, 20], sizes = [1, 20], strides = [1, 1]} : vector<1x80xf32> to vector<1x20xf32>
    %120 = vector.extract_strided_slice %117 {offsets = [0, 40], sizes = [1, 20], strides = [1, 1]} : vector<1x80xf32> to vector<1x20xf32>
    %cst_27 = arith.constant 2.000000e+00 : f32
    %121 = vector.broadcast %cst_27 : f32 to vector<1x20xf32>
    %122 = arith.mulf %121, %120 : vector<1x20xf32>
    %cst_28 = arith.constant 1.000000e+00 : f32
    %123 = vector.broadcast %cst_28 : f32 to vector<1x20xf32>
    %124 = arith.subf %122, %123 : vector<1x20xf32>
    %125 = vector.extract_strided_slice %117 {offsets = [0, 60], sizes = [1, 20], strides = [1, 1]} : vector<1x80xf32> to vector<1x20xf32>
    %126 = arith.mulf %119, %108 : vector<1x20xf32>
    %127 = arith.mulf %118, %124 : vector<1x20xf32>
    %128 = arith.addf %126, %127 : vector<1x20xf32>
    %129 = math.tanh %128 : vector<1x20xf32>
    %130 = arith.mulf %125, %129 : vector<1x20xf32>
    %c4_i32 = arith.constant 4 : i32
    %131 = arith.cmpi sgt, %1, %c4_i32 : i32
    %132 = arith.select %131, %128, %108 : vector<1x20xf32>
    %133 = arith.select %131, %130, %109 : vector<1x20xf32>
    %134 = vector.extract_strided_slice %11 {offsets = [5, 0], sizes = [1, 80], strides = [1, 1]} : vector<8x80xf32> to vector<1x80xf32>
    %cst_29 = arith.constant dense<0.000000e+00> : vector<1x80xf32>
    %135 = tpu.matmul %133, %7, %cst_29 {dimension_numbers = #tpu.dot_dimension_numbers<[1], [0], [0], [1], [0, 0, 1, 1], [], []>} : vector<1x20xf32>, vector<20x80xf32>, vector<1x80xf32> -> vector<1x80xf32>
    %136 = arith.addf %134, %135 : vector<1x80xf32>
    %137 = arith.negf %136 : vector<1x80xf32>
    %138 = math.exp %137 : vector<1x80xf32>
    %cst_30 = arith.constant 1.000000e+00 : f32
    %139 = vector.broadcast %cst_30 : f32 to vector<1x80xf32>
    %140 = arith.addf %139, %138 : vector<1x80xf32>
    %141 = arith.divf %139, %140 : vector<1x80xf32>
    %142 = vector.extract_strided_slice %141 {offsets = [0, 0], sizes = [1, 20], strides = [1, 1]} : vector<1x80xf32> to vector<1x20xf32>
    %143 = vector.extract_strided_slice %141 {offsets = [0, 20], sizes = [1, 20], strides = [1, 1]} : vector<1x80xf32> to vector<1x20xf32>
    %144 = vector.extract_strided_slice %141 {offsets = [0, 40], sizes = [1, 20], strides = [1, 1]} : vector<1x80xf32> to vector<1x20xf32>
    %cst_31 = arith.constant 2.000000e+00 : f32
    %145 = vector.broadcast %cst_31 : f32 to vector<1x20xf32>
    %146 = arith.mulf %145, %144 : vector<1x20xf32>
    %cst_32 = arith.constant 1.000000e+00 : f32
    %147 = vector.broadcast %cst_32 : f32 to vector<1x20xf32>
    %148 = arith.subf %146, %147 : vector<1x20xf32>
    %149 = vector.extract_strided_slice %141 {offsets = [0, 60], sizes = [1, 20], strides = [1, 1]} : vector<1x80xf32> to vector<1x20xf32>
    %150 = arith.mulf %143, %132 : vector<1x20xf32>
    %151 = arith.mulf %142, %148 : vector<1x20xf32>
    %152 = arith.addf %150, %151 : vector<1x20xf32>
    %153 = math.tanh %152 : vector<1x20xf32>
    %154 = arith.mulf %149, %153 : vector<1x20xf32>
    %c5_i32 = arith.constant 5 : i32
    %155 = arith.cmpi sgt, %1, %c5_i32 : i32
    %156 = arith.select %155, %152, %132 : vector<1x20xf32>
    %157 = arith.select %155, %154, %133 : vector<1x20xf32>
    %158 = vector.extract_strided_slice %11 {offsets = [6, 0], sizes = [1, 80], strides = [1, 1]} : vector<8x80xf32> to vector<1x80xf32>
    %cst_33 = arith.constant dense<0.000000e+00> : vector<1x80xf32>
    %159 = tpu.matmul %157, %7, %cst_33 {dimension_numbers = #tpu.dot_dimension_numbers<[1], [0], [0], [1], [0, 0, 1, 1], [], []>} : vector<1x20xf32>, vector<20x80xf32>, vector<1x80xf32> -> vector<1x80xf32>
    %160 = arith.addf %158, %159 : vector<1x80xf32>
    %161 = arith.negf %160 : vector<1x80xf32>
    %162 = math.exp %161 : vector<1x80xf32>
    %cst_34 = arith.constant 1.000000e+00 : f32
    %163 = vector.broadcast %cst_34 : f32 to vector<1x80xf32>
    %164 = arith.addf %163, %162 : vector<1x80xf32>
    %165 = arith.divf %163, %164 : vector<1x80xf32>
    %166 = vector.extract_strided_slice %165 {offsets = [0, 0], sizes = [1, 20], strides = [1, 1]} : vector<1x80xf32> to vector<1x20xf32>
    %167 = vector.extract_strided_slice %165 {offsets = [0, 20], sizes = [1, 20], strides = [1, 1]} : vector<1x80xf32> to vector<1x20xf32>
    %168 = vector.extract_strided_slice %165 {offsets = [0, 40], sizes = [1, 20], strides = [1, 1]} : vector<1x80xf32> to vector<1x20xf32>
    %cst_35 = arith.constant 2.000000e+00 : f32
    %169 = vector.broadcast %cst_35 : f32 to vector<1x20xf32>
    %170 = arith.mulf %169, %168 : vector<1x20xf32>
    %cst_36 = arith.constant 1.000000e+00 : f32
    %171 = vector.broadcast %cst_36 : f32 to vector<1x20xf32>
    %172 = arith.subf %170, %171 : vector<1x20xf32>
    %173 = vector.extract_strided_slice %165 {offsets = [0, 60], sizes = [1, 20], strides = [1, 1]} : vector<1x80xf32> to vector<1x20xf32>
    %174 = arith.mulf %167, %156 : vector<1x20xf32>
    %175 = arith.mulf %166, %172 : vector<1x20xf32>
    %176 = arith.addf %174, %175 : vector<1x20xf32>
    %177 = math.tanh %176 : vector<1x20xf32>
    %178 = arith.mulf %173, %177 : vector<1x20xf32>
    %c6_i32 = arith.constant 6 : i32
    %179 = arith.cmpi sgt, %1, %c6_i32 : i32
    %180 = arith.select %179, %176, %156 : vector<1x20xf32>
    %181 = arith.select %179, %178, %157 : vector<1x20xf32>
    %182 = vector.extract_strided_slice %11 {offsets = [7, 0], sizes = [1, 80], strides = [1, 1]} : vector<8x80xf32> to vector<1x80xf32>
    %cst_37 = arith.constant dense<0.000000e+00> : vector<1x80xf32>
    %183 = tpu.matmul %181, %7, %cst_37 {dimension_numbers = #tpu.dot_dimension_numbers<[1], [0], [0], [1], [0, 0, 1, 1], [], []>} : vector<1x20xf32>, vector<20x80xf32>, vector<1x80xf32> -> vector<1x80xf32>
    %184 = arith.addf %182, %183 : vector<1x80xf32>
    %185 = arith.negf %184 : vector<1x80xf32>
    %186 = math.exp %185 : vector<1x80xf32>
    %cst_38 = arith.constant 1.000000e+00 : f32
    %187 = vector.broadcast %cst_38 : f32 to vector<1x80xf32>
    %188 = arith.addf %187, %186 : vector<1x80xf32>
    %189 = arith.divf %187, %188 : vector<1x80xf32>
    %190 = vector.extract_strided_slice %189 {offsets = [0, 0], sizes = [1, 20], strides = [1, 1]} : vector<1x80xf32> to vector<1x20xf32>
    %191 = vector.extract_strided_slice %189 {offsets = [0, 20], sizes = [1, 20], strides = [1, 1]} : vector<1x80xf32> to vector<1x20xf32>
    %192 = vector.extract_strided_slice %189 {offsets = [0, 40], sizes = [1, 20], strides = [1, 1]} : vector<1x80xf32> to vector<1x20xf32>
    %cst_39 = arith.constant 2.000000e+00 : f32
    %193 = vector.broadcast %cst_39 : f32 to vector<1x20xf32>
    %194 = arith.mulf %193, %192 : vector<1x20xf32>
    %cst_40 = arith.constant 1.000000e+00 : f32
    %195 = vector.broadcast %cst_40 : f32 to vector<1x20xf32>
    %196 = arith.subf %194, %195 : vector<1x20xf32>
    %197 = vector.extract_strided_slice %189 {offsets = [0, 60], sizes = [1, 20], strides = [1, 1]} : vector<1x80xf32> to vector<1x20xf32>
    %198 = arith.mulf %191, %180 : vector<1x20xf32>
    %199 = arith.mulf %190, %196 : vector<1x20xf32>
    %200 = arith.addf %198, %199 : vector<1x20xf32>
    %201 = math.tanh %200 : vector<1x20xf32>
    %202 = arith.mulf %197, %201 : vector<1x20xf32>
    %c7_i32 = arith.constant 7 : i32
    %203 = arith.cmpi sgt, %1, %c7_i32 : i32
    %204 = arith.select %203, %202, %181 : vector<1x20xf32>
    %c0_41 = arith.constant 0 : index
    %c0_42 = arith.constant 0 : index
    %c0_43 = arith.constant 0 : index
    %205 = vector.load %arg3[%c0_41, %c0_42, %c0_43] : memref<1x1x28xf32, #tpu.memory_space<vmem>>, vector<1x1x28xf32>
    %206 = vector.shape_cast %205 : vector<1x1x28xf32> to vector<1x28xf32>
    %207 = vector.extract_strided_slice %206 {offsets = [0, 0], sizes = [1, 20], strides = [1, 1]} : vector<1x28xf32> to vector<1x20xf32>
    %208 = arith.mulf %204, %207 : vector<1x20xf32>
    %209 = vector.extract_strided_slice %206 {offsets = [0, 20], sizes = [1, 8], strides = [1, 1]} : vector<1x28xf32> to vector<1x8xf32>
    %210 = arith.mulf %5, %209 : vector<1x8xf32>
    %c32 = arith.constant 32 : index
    %c0_44 = arith.constant 0 : index
    %211 = vector.load %arg4[%c32, %c0_44] : memref<192x128xf32, #tpu.memory_space<vmem>>, vector<20x64xf32>
    %cst_45 = arith.constant dense<0.000000e+00> : vector<1x64xf32>
    %212 = tpu.matmul %208, %211, %cst_45 {dimension_numbers = #tpu.dot_dimension_numbers<[1], [0], [0], [1], [0, 0, 1, 1], [], []>} : vector<1x20xf32>, vector<20x64xf32>, vector<1x64xf32> -> vector<1x64xf32>
    %c56 = arith.constant 56 : index
    %c0_46 = arith.constant 0 : index
    %213 = vector.load %arg4[%c56, %c0_46] : memref<192x128xf32, #tpu.memory_space<vmem>>, vector<8x64xf32>
    %cst_47 = arith.constant dense<0.000000e+00> : vector<1x64xf32>
    %214 = tpu.matmul %210, %213, %cst_47 {dimension_numbers = #tpu.dot_dimension_numbers<[1], [0], [0], [1], [0, 0, 1, 1], [], []>} : vector<1x8xf32>, vector<8x64xf32>, vector<1x64xf32> -> vector<1x64xf32>
    %215 = arith.addf %212, %214 : vector<1x64xf32>
    %c1 = arith.constant 1 : index
    %c0_48 = arith.constant 0 : index
    %216 = vector.load %arg5[%c1, %c0_48] : memref<8x128xf32, #tpu.memory_space<vmem>>, vector<1x64xf32>
    %217 = arith.addf %215, %216 : vector<1x64xf32>
    %c5 = arith.constant 5 : index
    %c0_49 = arith.constant 0 : index
    %218 = vector.load %arg5[%c5, %c0_49] : memref<8x128xf32, #tpu.memory_space<vmem>>, vector<1x64xf32>
    %cst_50 = arith.constant 0.000000e+00 : f32
    %219 = vector.broadcast %cst_50 : f32 to vector<1x64xf32>
    %220 = arith.maximumf %217, %219 : vector<1x64xf32>
    %cst_51 = arith.constant 0.000000e+00 : f32
    %221 = vector.broadcast %cst_51 : f32 to vector<1x64xf32>
    %222 = arith.minimumf %217, %221 : vector<1x64xf32>
    %223 = arith.mulf %218, %222 : vector<1x64xf32>
    %224 = arith.addf %220, %223 : vector<1x64xf32>
    %c64 = arith.constant 64 : index
    %c0_52 = arith.constant 0 : index
    %225 = vector.load %arg4[%c64, %c0_52] : memref<192x128xf32, #tpu.memory_space<vmem>>, vector<64x32xf32>
    %cst_53 = arith.constant dense<0.000000e+00> : vector<1x32xf32>
    %226 = tpu.matmul %224, %225, %cst_53 {dimension_numbers = #tpu.dot_dimension_numbers<[1], [0], [0], [1], [0, 0, 1, 1], [], []>} : vector<1x64xf32>, vector<64x32xf32>, vector<1x32xf32> -> vector<1x32xf32>
    %c2 = arith.constant 2 : index
    %c0_54 = arith.constant 0 : index
    %227 = vector.load %arg5[%c2, %c0_54] : memref<8x128xf32, #tpu.memory_space<vmem>>, vector<1x32xf32>
    %228 = arith.addf %226, %227 : vector<1x32xf32>
    %c6 = arith.constant 6 : index
    %c0_55 = arith.constant 0 : index
    %229 = vector.load %arg5[%c6, %c0_55] : memref<8x128xf32, #tpu.memory_space<vmem>>, vector<1x32xf32>
    %cst_56 = arith.constant 0.000000e+00 : f32
    %230 = vector.broadcast %cst_56 : f32 to vector<1x32xf32>
    %231 = arith.maximumf %228, %230 : vector<1x32xf32>
    %cst_57 = arith.constant 0.000000e+00 : f32
    %232 = vector.broadcast %cst_57 : f32 to vector<1x32xf32>
    %233 = arith.minimumf %228, %232 : vector<1x32xf32>
    %234 = arith.mulf %229, %233 : vector<1x32xf32>
    %235 = arith.addf %231, %234 : vector<1x32xf32>
    %c128 = arith.constant 128 : index
    %c0_58 = arith.constant 0 : index
    %236 = vector.load %arg4[%c128, %c0_58] : memref<192x128xf32, #tpu.memory_space<vmem>>, vector<32x32xf32>
    %cst_59 = arith.constant dense<0.000000e+00> : vector<1x32xf32>
    %237 = tpu.matmul %235, %236, %cst_59 {dimension_numbers = #tpu.dot_dimension_numbers<[1], [0], [0], [1], [0, 0, 1, 1], [], []>} : vector<1x32xf32>, vector<32x32xf32>, vector<1x32xf32> -> vector<1x32xf32>
    %c3 = arith.constant 3 : index
    %c0_60 = arith.constant 0 : index
    %238 = vector.load %arg5[%c3, %c0_60] : memref<8x128xf32, #tpu.memory_space<vmem>>, vector<1x32xf32>
    %239 = arith.addf %237, %238 : vector<1x32xf32>
    %c7 = arith.constant 7 : index
    %c0_61 = arith.constant 0 : index
    %240 = vector.load %arg5[%c7, %c0_61] : memref<8x128xf32, #tpu.memory_space<vmem>>, vector<1x32xf32>
    %cst_62 = arith.constant 0.000000e+00 : f32
    %241 = vector.broadcast %cst_62 : f32 to vector<1x32xf32>
    %242 = arith.maximumf %239, %241 : vector<1x32xf32>
    %cst_63 = arith.constant 0.000000e+00 : f32
    %243 = vector.broadcast %cst_63 : f32 to vector<1x32xf32>
    %244 = arith.minimumf %239, %243 : vector<1x32xf32>
    %245 = arith.mulf %240, %244 : vector<1x32xf32>
    %246 = arith.addf %242, %245 : vector<1x32xf32>
    %c160 = arith.constant 160 : index
    %c0_64 = arith.constant 0 : index
    %247 = vector.load %arg4[%c160, %c0_64] : memref<192x128xf32, #tpu.memory_space<vmem>>, vector<32x4xf32>
    %cst_65 = arith.constant dense<0.000000e+00> : vector<1x4xf32>
    %248 = tpu.matmul %246, %247, %cst_65 {dimension_numbers = #tpu.dot_dimension_numbers<[1], [0], [0], [1], [0, 0, 1, 1], [], []>} : vector<1x32xf32>, vector<32x4xf32>, vector<1x4xf32> -> vector<1x4xf32>
    %c4 = arith.constant 4 : index
    %c0_66 = arith.constant 0 : index
    %249 = vector.load %arg5[%c4, %c0_66] : memref<8x128xf32, #tpu.memory_space<vmem>>, vector<1x4xf32>
    %250 = arith.addf %248, %249 : vector<1x4xf32>
    %cst_67 = arith.constant dense<0xFF800000> : vector<1xf32>
    %251 = vector.multi_reduction <maximumf>, %250, %cst_67 [1] : vector<1x4xf32> to vector<1xf32>
    %252 = vector.shape_cast %251 : vector<1xf32> to vector<1x1xf32>
    %253 = vector.broadcast %252 : vector<1x1xf32> to vector<1x4xf32>
    %254 = arith.subf %250, %253 : vector<1x4xf32>
    %255 = math.exp %254 : vector<1x4xf32>
    %cst_68 = arith.constant dense<0.000000e+00> : vector<1xf32>
    %256 = vector.multi_reduction <add>, %255, %cst_68 [1] : vector<1x4xf32> to vector<1xf32>
    %257 = vector.shape_cast %256 : vector<1xf32> to vector<1x1xf32>
    %258 = vector.broadcast %257 : vector<1x1xf32> to vector<1x4xf32>
    %259 = arith.divf %255, %258 : vector<1x4xf32>
    %c0_69 = arith.constant 0 : index
    %c0_70 = arith.constant 0 : index
    %c0_71 = arith.constant 0 : index
    %260 = vector.load %arg6[%c0_69, %c0_70, %c0_71] : memref<1x1x4xf32, #tpu.memory_space<vmem>>, vector<1x1x4xf32>
    %261 = vector.shape_cast %260 : vector<1x1x4xf32> to vector<1x4xf32>
    %262 = vector.shape_cast %259 : vector<1x4xf32> to vector<1x1x4xf32>
    tpu.vector_store %arg6[%c0_69, %c0_70, %c0_71], %262 {strides = array<i32>} : memref<1x1x4xf32, #tpu.memory_space<vmem>>, vector<1x1x4xf32>,
    return
  }
  func.func @transform_0(%arg0: i32, %arg1: memref<2xi32, #tpu.memory_space<smem>>) -> (i32, i32, i32) {
    %c0_i32 = arith.constant 0 : i32
    %c0_i32_0 = arith.constant 0 : i32
    %c0_i32_1 = arith.constant 0 : i32
    return %arg0, %c0_i32, %c0_i32_0 : i32, i32, i32
  }
  func.func @transform_1(%arg0: i32, %arg1: memref<2xi32, #tpu.memory_space<smem>>) -> (i32, i32, i32) {
    %c0_i32 = arith.constant 0 : i32
    %c0_i32_0 = arith.constant 0 : i32
    %c0_i32_1 = arith.constant 0 : i32
    return %arg0, %c0_i32, %c0_i32_0 : i32, i32, i32
  }
  func.func @transform_2(%arg0: i32, %arg1: memref<2xi32, #tpu.memory_space<smem>>) -> (i32, i32) {
    %c0_i32 = arith.constant 0 : i32
    %c0_i32_0 = arith.constant 0 : i32
    %c0_i32_1 = arith.constant 0 : i32
    return %c0_i32, %c0_i32_0 : i32, i32
  }
  func.func @transform_3(%arg0: i32, %arg1: memref<2xi32, #tpu.memory_space<smem>>) -> (i32, i32) {
    %c0_i32 = arith.constant 0 : i32
    %c0_i32_0 = arith.constant 0 : i32
    %c0_i32_1 = arith.constant 0 : i32
    return %c0_i32, %c0_i32_0 : i32, i32
  }
  func.func @transform_4(%arg0: i32, %arg1: memref<2xi32, #tpu.memory_space<smem>>) -> (i32, i32, i32) {
    %c0_i32 = arith.constant 0 : i32
    %c0_i32_0 = arith.constant 0 : i32
    %c0_i32_1 = arith.constant 0 : i32
    return %arg0, %c0_i32, %c0_i32_0 : i32, i32, i32
  }
}

</mosaic_0001>

<bundles_post_ra>
// kernel: tpu_custom_call.1
= control target key start
LH: loop header
LB: loop body
LE: loop exit
PB: predicated region body
PF: predicated region fallthrough
CT: control target
= control target key end

     0   :  { %s2711_s0 = inlined_call_operand.vmem [shape: s32[2], index: 0, kind: input, shape index: {}]   ;;  %s2712_s1 = inlined_call_operand.vmem [shape: f32[2,9,8], index: 1, kind: input, shape index: {}]   ;;  %s2713_s2 = inlined_call_operand.vmem [shape: f32[2,1,28], index: 2, kind: input, shape index: {}]   ;;  %s2714_s3 = inlined_call_operand.hbm [shape: f32[192,128], index: 3, kind: input, shape index: {}]   ;;  %s2715_s4 = inlined_call_operand.vmem [shape: f32[8,128], index: 4, kind: input, shape index: {}]   ;;  %s2716_s5 = inlined_call_operand.hbm [shape: f32[2,1,4], index: 5, kind: output, shape index: {}]  }
   0x1   :  { %s10_s20 = sshll.u32 %s2711_s0, 4  ;;  %s11_s20 = int_to_ptr.vmem [resolvable:$true] %s10_s20 }
   0x2   :  { %s2174_s21 = scalar_lea.vmem %s11_s20, 16  ;;  %p2179_p1 = scmp.lt.s32.totalorder %s11_s20, %s11_s20 }
   0x3   :  { %p2175_p0 = scmp.ne.s32.totalorder %s11_s20, %s2174_s21  ;;  %p2180_p2 = scmp.lt.s32.totalorder %s2174_s21, %s2174_s21 }
   0x5   :  { %p2181_p3 = por %p2180_p2, %p2179_p1 }
   0x7   :  { %p2182_p4 = pnand %p2181_p3, %p2175_p0 }
   0x9   :  { %2185 = shalt.err (!%p2182_p4)  }
   0xa   :  { %s2284_s22 = smov [#allocation3]  }
   0xb   :  { %13 = dma.vmem_to_smem %s11_s20, 16, %s2284_s22, [#allocation2] }
   0xc   :  { %2258 = dma.done.wait [#allocation2], 16 }
   0xd   :  { %2259 = vsyncadd [#allocation2], 4294967280 }
   0xe   :  { %15 = sfence }
   0xf   :  { %16 = vsyncpa [#allocation5], 0 }
  0x10   :  { %17 = vsyncpa [#allocation6], 0 }
  0x11   :  { %19 = vsyncpa [#allocation6 + $0x1], 0  ;;  %s2331_s23 = smov 0   ;;  %s2333_s24 = smov 0  }
  0x12   :  { %s2335_s0 = smov 0   ;;  %s2337_s25 = smov 0  }
  0x13 LB: > { %s2352_s26 = sadd.s32 4294967295, %s2282_s25   ;;  %s1766_s27 = sadd.s32 4294967294, %s2282_s25   ;;  %s2282_s25 = sphi %s2337_s25, %s2746_s25   ;;  %s2278_s0 = sphi %s2335_s0, %s2745_s0   ;;  %s2274_s24 = sphi %s2333_s24, %s2744_s24   ;;  %s2270_s23 = sphi %s2331_s23, %s2743_s23  }
  0x14   : > { %s2356_s28 = sadd.s32 1, %s2282_s25   ;;  %s126_s29 = sadd.s32 1, %s2278_s0 }
  0x15   : > { %s123_s30 = ssub.s32 %s2282_s25, %s2356_s28  ;;  %p136_p5 = scmp.ne.s32.totalorder %s2278_s0, %s2274_s24 }
  0x16   : > { %p124_p6 = scmp.eq.s32.totalorder %s123_s30, 0  ;;  %p137_p7 = scmp.eq.s32.totalorder %s2352_s26, 1 }
  0x17   : > { %p142_p8 = scmp.ne.s32.totalorder %s2274_s24, %s2270_s23  ;;  %p143_p9 = scmp.eq.s32.totalorder %s1766_s27, 1 }
  0x18   : > { %s2367_s6 = scalar_select %p124_p6, %s2278_s0, %s126_s29  }
  0x19   : > { %p2369_p10 = por %p137_p7, %p136_p5  ;;  %p2373_p11 = por %p143_p9, %p142_p8 }
  0x1a   : > { %p1767_p12 = scmp.ge.s32.totalorder %s2282_s25, 1  ;;  %p150_p13 = scmp.lt.s32.totalorder %s2282_s25, 3 }
  0x1b   : > { %s2720_s7 = scalar_select %p2369_p10, 1, 0 }
  0x1c   : > { %s2721_s8 = scalar_select %p2373_p11, 1, 0 }
  0x1d   : > { %p2717_p0 = scmp.eq.s32.totalorder %s2352_s26, 0  ;;  %p2380_p1 = pnand %p1767_p12, %p150_p13 }
  0x1e   : > { %s2285_s10 = smov [#allocation4]   ;;  %s2186_s15 = scalar_lea.hbm %s2714_s3, 3072 }
  0x1f   : > { %s2722_s9 = scalar_select %p2380_p1, 1, 0 }
  0x20   : > { %s162_s11 = sshll.u32 %s2285_s10, 4  ;;  %p2066_p2 = pneg %p2380_p1  ;;  %s163_s11 = int_to_ptr.vmem [resolvable:$true] %s162_s11 }
  0x21   : > { %p2187_p4 = scmp.ne.s32.totalorder %s2714_s3, %s2186_s15  ;;  %p2193_p8 = scmp.lt.u32.totalorder %s2186_s15, %s2714_s3 }
  0x22   : > { %p2388_p3 = pnand %p2717_p0, %p2066_p2 }
  0x24   : > { %p2188_p5 = pneg %p2388_p3 }
  0x26   : > { %p2189_p6 = pnand %p2188_p5, %p2187_p4 }
  0x28   : > { %p2190_p7 = pneg %p2189_p6 }
  0x2a   : > { %p2195_p9 = pnand %p2193_p8, %p2190_p7 }
  0x2c   : > { %2198 = shalt.err (!%p2195_p9)
}
  0x2d   : > { %s2199_s20 = scalar_lea.vmem %s163_s11, 3072  ;;  %p2207_p0 = scmp.lt.s32.totalorder %s163_s11, %s163_s11 }
  0x2e   : > { %p2200_p12 = scmp.ne.s32.totalorder %s163_s11, %s2199_s20  ;;  %p2208_p11 = scmp.lt.s32.totalorder %s2199_s20, %s2199_s20 }
  0x30   : > { %p2202_p13 = pnand %p2200_p12, %p2188_p5  ;;  %p2209_p10 = por %p2208_p11, %p2207_p0 }
  0x32   : > { %p2203_p2 = pneg %p2202_p13 }
  0x34   : > { %p2210_p1 = pnand %p2209_p10, %p2203_p2 }
  0x36   : > { %2213 = shalt.err (!%p2210_p1)
}
  0x37   : > { %s2286_s21 = smov 128   ;;  %s2287_s22 = smov 8  }
  0x38   : > { %2069 = dma.hbm_to_vmem [thread:$0]  (!%p2388_p3), %s2714_s3, 3072, %s163_s11, [#allocation5], %s2286_s21, %s2286_s21, %s2287_s22  }
  0x39   : > { %p2724_p4 = scmp.ne.s32.totalorder %s2722_s9, 0 }
  0x3a   : > { %p2725_p6 = scmp.eq.s32.totalorder (!%p2724_p4), %s2352_s26, 0 }
  0x3b   : > { %195 = sbr.rel (%p2724_p4) target bundleno = 7090 (0x1bb2), region = 36 }
  0x42   : > { %2261 = dma.done.wait (%p2725_p6), [#allocation5], 3072   ;;  %p2726_p5 = pmov %p2725_p6 }
  0x43   : > { %p223_p10 = scmp.lt.s32.totalorder %s2352_s26, 1  ;;  %v2288_v0 = vmov 0.0   ;;  %vm2289_vm0 = vmmov 0   ;;  %v2290_v1 = vmov 0.0|0.0   ;;  %vm243_vm1 = vcmask 64512   ;;  %v234_v2 = vld [vmem:[#allocation4] sm:$0xff] }
  0x44   : > { %2263 = vsyncadd (%p2726_p5), [#allocation5], 4294964224  ;;  %1877 = vmatprep.subr.mxu1 %v2288_v0  ;;  %1879 = vmatprep.mubr.msk.f32.mxu1 %vm2289_vm0, %v2288_v0  ;;  %v235_v4 = vld [vmem:[#allocation4 + $0x8] sm:$0xff]  ;;  %v236_v5 = vld [vmem:[#allocation4 + $0x10] sm:$0xff]  ;;  %vm321_vm2 = vcmask 1043456   ;;  %s2291_s15 = smov 88  }
  0x45   : > { %s2419_s30 = scalar_select %p223_p10, %s2352_s26, 1  ;;  %2012 = vmatprep.subr.bf16.mxu0 %v2290_v1  ;;  %1897 = vmatprep.mubr.msk.f32.mxu0 %vm2289_vm0, %v2288_v0  ;;  %v2433_v6 = vpack.c.bf16 %v236_v5, %v235_v4  ;;  %v2440_v7 = vld [vmem:[#allocation4 + $0x18] sm:$0xf]  ;;  %v1774_v10 = vld [vmem:[%s2715_s4] ss:$0 sm:$0xff]  ;;  %vm317_vm4 = vcmask 162816  }
  0x46   : > { %1878 = vmatpush3.msra.mxu1 %v234_v2  ;;  %s2292_s16 = smov 20   ;;  %s2293_s17 = smov 40   ;;  %vm1423_vm12 = vcmask 523264   ;;  %vm1507_vm13 = vcmask 261120   ;;  %vm1664_vm14 = vcmask 24576  }
  0x47   : > { %s1817_s9 = sshll.u32 %s2419_s30, 4  ;;  %2009 = vmatprep.subr.bf16.mxu1 %v2290_v1  ;;  %2014 = vmatpush3.bf16.msra.mxu0 %v2433_v6  ;;  %s2467_s18 = sld [smem:[#allocation3 + %s2352_s26]] }
  0x48   : > { %s2428_s12 = scalar_lea.vmem %s2712_s1, %s1817_s9  ;;  %1895 = vmatprep.subr.mxu0 %v2288_v0  ;;  %s2294_s20 = smov 68  }
  0x49   : > { %v232_v3 = vld [vmem:[%s2428_s12] sm:$0xff]  ;;  %s230_s14 = scalar_lea.vmem %s2713_s2, %s2419_s30  ;;  %s2296_s30 = smov 108  }
  0x4a   : > { %1880 = vmatmul.mubr.msk.f32.vlgmr.msra.gmra.mrb[0].mxu1 %vm243_vm1, %v232_v3  ;;  %p2741_p2 = scmp.ne.s32.totalorder %s2720_s7, 0 }
  0x4b   : > { %1888 = vmatprep.mubr.msk.f32.mxu1 %vm2289_vm0, %v2288_v0  ;;  %2011 = vmatpush3.bf16.msra.mxu1 %v2433_v6 }
  0x4c   : > { %1886 = vmatprep.subr.mxu1 %v2288_v0  ;;  %1896 = vmatpush3.msk.msra.mxu0 %vm321_vm2, %v2440_v7 }
  0x4d   : > { %2018 = vmatprep.subr.bf16.mxu0 %v2290_v1  ;;  %p421_p11 = scmp.gt.s32.totalorder %s2467_s18, 0  ;;  %p534_p0 = scmp.gt.s32.totalorder %s2467_s18, 1 }
  0x4e   : > { %p650_p1 = scmp.gt.s32.totalorder %s2467_s18, 2  ;;  %p766_p3 = scmp.gt.s32.totalorder %s2467_s18, 3 }
  0x4f   : > { %1887 = vmatpush3.msk.msra.mxu1 %vm321_vm2, %v2440_v7  ;;  %s422_s19 = scalar_select %p421_p11, 1, 0 }
  0x50   : > { %1889 = vmatmul.mubr.f32.vlgmr.msra.gmra.mrb[2].mxu1 %v2288_v0  ;;  %2015 = vmatprep.subr.bf16.mxu1 %v2290_v1  ;;  %s535_s21 = scalar_select %p534_p0, 1, 0 }
  0x51   : > { %2017 = vmatpush3.bf16.msra.mxu1 %v2433_v6  ;;  %1906 = vmatprep.mubr.msk.f32.mxu1 %vm2289_vm0, %v2288_v0  ;;  %v423_v27 = vstv %s422_s19  ;;  %s651_s22 = scalar_select %p650_p1, 1, 0 }
  0x52   : > { %1904 = vmatprep.subr.mxu1 %v2288_v0  ;;  %vm2470_vm3 = vcmp.eq.s32.totalorder %v423_v27, 1  ;;  %v536_v51 = vstv %s535_s21  ;;  %s767_s27 = scalar_select %p766_p3, 1, 0 }
  0x53   : > { %vm2492_vm5 = vcmp.eq.s32.totalorder %v536_v51, 1  ;;  %p882_p7 = scmp.gt.s32.totalorder %s2467_s18, 4  ;;  %p998_p8 = scmp.gt.s32.totalorder %s2467_s18, 5 }
  0x54   : > { %p1114_p9 = scmp.gt.s32.totalorder %s2467_s18, 6  ;;  %s2295_s19 = smov 60  }
  0x55   : > { %1905 = vmatpush3.msk.msra.mxu1 %vm321_vm2, %v2440_v7  ;;  %s883_s29 = scalar_select %p882_p7, 1, 0 }
  0x56   : > { %2021 = vmatprep.subr.bf16.mxu1 %v2290_v1  ;;  %s999_s9 = scalar_select %p998_p8, 1, 0 }
  0x57   : > { %s1115_s10 = scalar_select %p1114_p9, 1, 0 }
  0x58   : > { %p1230_p12 = scmp.gt.s32.totalorder %s2467_s18, 7 }
 0x11d   : > { %v313_v8 = vpop.f32.mrb[0].mxu1 }
 0x11e   : > { %v1881_v9 = vpop.f32.mrb[1].mxu1  ;;  %v2460_v11 = vadd.f32 %v1774_v10, %v313_v8 }
 0x123   : > { %v391_v12 = vpop.f32.mrb[2].mxu1 }
 0x124   : > { %v395_v13 = vadd.f32 %v391_v12, %v2460_v11  ;;  %v1890_v14 = vpop.f32.mrb[3].mxu1 }
 0x126   : > { %v1777_v15 = vmul.f32 -1.442695, %v395_v13 }
 0x128   : > { %2122 = vpow2.f32 %v1777_v15 }
 0x132   : > { %v2123_v16 = vpop.eup %2122 }
 0x133   : > { %v399_v17 = vadd.f32 1.0, %v2123_v16 }
 0x135   : > { %2124 = vrcp.f32 %v399_v17 }
 0x13f   : > { %v2125_v18 = vpop.eup %2124 }
 0x140   : > { %v402_v19 = vmul.f32 2.0, %v2125_v18  ;;  %v404_v23 = vmul.f32 0.0, %v2125_v18 }
 0x142   : > { %v1778_v20 = vadd.f32 -1.0, %v402_v19 }
 0x144   : > { %406 = vrot.lane.b32.xlu0 %v1778_v20, %s2291_s15 }
 0x1b6   : > { %v407_v21 = vpop.permute.xlu0 %406 }
 0x1b7   : > { %v409_v22 = vmul.f32 %v2125_v18, %v407_v21 }
 0x1b9   : > { %411 = vrot.lane.b32.xlu0 %v409_v22, %s2292_s16 }
 0x22b   : > { %v412_v24 = vpop.permute.xlu0 %411 }
 0x22c   : > { %v414_v25 = vadd.f32 %v412_v24, %v404_v23 }
 0x22e   : > { %2126 = vtanh.f32 %v414_v25  ;;  %v425_v45 = vsel %vm2470_vm3, %v414_v25, 0.0 }
 0x22f   : > { %v515_v46 = vrot.slane %v425_v45, 7 }
 0x238   : > { %v2127_v26 = vpop.eup %2126 }
 0x239   : > { %417 = vrot.lane.b32.xlu1 %v2127_v26, %s2293_s17 }
 0x2ab   : > { %v418_v28 = vpop.permute.xlu1 %417 }
 0x2ac   : > { %v420_v29 = vmul.f32 %v2125_v18, %v418_v28  ;;  %v652_v18 = vstv %s651_s22 }
 0x2ad   : > { %vm2514_vm6 = vcmp.eq.s32.totalorder %v652_v18, 1 }
 0x2ae   : > { %v426_v31 = vsel %vm2470_vm3, %v420_v29, 0.0 }
 0x2af   : > { %428 = vrot.lane.b32.xlu1 %v426_v31, %s2294_s20  ;;  %v539_v53 = vrot.slane %v426_v31, 7 }
 0x321   : > { %v429_v32 = vpop.permute.xlu1 %428 }
 0x322   : > { %1898 = vmatmul.mubr.msk.f32.vlgmr.msra.gmra.mrb[0].mxu0 %vm317_vm4, %v429_v32 }
 0x323   : > { %2020 = vmatpush3.bf16.msra.mxu0 %v2433_v6  ;;  %1915 = vmatprep.mubr.msk.f32.mxu0 %vm2289_vm0, %v2288_v0 }
 0x324   : > { %1913 = vmatprep.subr.mxu0 %v2288_v0 }
 0x327   : > { %1914 = vmatpush3.msk.msra.mxu0 %vm321_vm2, %v2440_v7 }
 0x328   : > { %2024 = vmatprep.subr.bf16.mxu0 %v2290_v1 }
 0x3f5   : > { %v498_v33 = vpop.f32.mrb[0].mxu0 }
 0x3f6   : > { %v503_v34 = vrot.slane %v498_v33, 7  ;;  %v1899_v35 = vpop.f32.mrb[1].mxu0 }
 0x3f8   : > { %v505_v36 = vadd.f32 %v503_v34, %v2460_v11 }
 0x3fa   : > { %v1781_v37 = vmul.f32 -1.442695, %v505_v36 }
 0x3fc   : > { %2128 = vpow2.f32 %v1781_v37 }
 0x406   : > { %v2129_v38 = vpop.eup %2128 }
 0x407   : > { %v509_v39 = vadd.f32 1.0, %v2129_v38 }
 0x409   : > { %2130 = vrcp.f32 %v509_v39 }
 0x413   : > { %v2131_v40 = vpop.eup %2130 }
 0x414   : > { %v512_v41 = vmul.f32 2.0, %v2131_v40  ;;  %v517_v47 = vmul.f32 %v2131_v40, %v515_v46 }
 0x416   : > { %v1782_v42 = vadd.f32 -1.0, %v512_v41 }
 0x418   : > { %519 = vrot.lane.b32.xlu0 %v1782_v42, %s2291_s15 }
 0x48a   : > { %v520_v43 = vpop.permute.xlu0 %519 }
 0x48b   : > { %v522_v44 = vmul.f32 %v2131_v40, %v520_v43 }
 0x48d   : > { %524 = vrot.lane.b32.xlu1 %v522_v44, %s2292_s16  ;;  %v768_v44 = vstv %s767_s27 }
 0x48e   : > { %vm2536_vm7 = vcmp.eq.s32.totalorder %v768_v44, 1 }
 0x4ff   : > { %v525_v48 = vpop.permute.xlu1 %524 }
 0x500   : > { %v527_v49 = vadd.f32 %v525_v48, %v517_v47 }
 0x502   : > { %2132 = vtanh.f32 %v527_v49  ;;  %v538_v12 = vsel %vm2492_vm5, %v527_v49, %v515_v46 }
 0x503   : > { %v631_v13 = vrot.slane %v538_v12, 7 }
 0x50c   : > { %v2133_v50 = vpop.eup %2132 }
 0x50d   : > { %530 = vrot.lane.b32.xlu0 %v2133_v50, %s2293_s17 }
 0x57f   : > { %v531_v52 = vpop.permute.xlu0 %530 }
 0x580   : > { %v533_v54 = vmul.f32 %v2131_v40, %v531_v52 }
 0x582   : > { %v541_v56 = vsel %vm2492_vm5, %v533_v54, %v539_v53 }
 0x583   : > { %v543_v57 = vrot.slane %v541_v56, 1  ;;  %v655_v20 = vrot.slane %v541_v56, 7 }
 0x585   : > { %544 = vrot.lane.b32.xlu1 %v543_v57, %s2294_s20 }
 0x5f7   : > { %v545_v58 = vpop.permute.xlu1 %544 }
 0x5f8   : > { %1907 = vmatmul.mubr.msk.f32.vlgmr.msra.gmra.mrb[4].mxu1 %vm317_vm4, %v545_v58 }
 0x5f9   : > { %2023 = vmatpush3.bf16.msra.mxu1 %v2433_v6  ;;  %1924 = vmatprep.mubr.msk.f32.mxu1 %vm2289_vm0, %v2288_v0 }
 0x5fa   : > { %1922 = vmatprep.subr.mxu1 %v2288_v0 }
 0x5fd   : > { %1923 = vmatpush3.msk.msra.mxu1 %vm321_vm2, %v2440_v7 }
 0x5fe   : > { %2027 = vmatprep.subr.bf16.mxu1 %v2290_v1 }
 0x6cb   : > { %v614_v59 = vpop.f32.mrb[4].mxu1 }
 0x6cc   : > { %v619_v60 = vrot.slane %v614_v59, 6  ;;  %v1908_v61 = vpop.f32.mrb[5].mxu1 }
 0x6ce   : > { %v621_v62 = vadd.f32 %v619_v60, %v2460_v11 }
 0x6d0   : > { %v1785_v63 = vmul.f32 -1.442695, %v621_v62 }
 0x6d2   : > { %2134 = vpow2.f32 %v1785_v63 }
 0x6dc   : > { %v2135_v2 = vpop.eup %2134 }
 0x6dd   : > { %v625_v3 = vadd.f32 1.0, %v2135_v2 }
 0x6df   : > { %2136 = vrcp.f32 %v625_v3 }
 0x6e9   : > { %v2137_v4 = vpop.eup %2136 }
 0x6ea   : > { %v628_v5 = vmul.f32 2.0, %v2137_v4  ;;  %v633_v14 = vmul.f32 %v2137_v4, %v631_v13 }
 0x6ec   : > { %v1786_v8 = vadd.f32 -1.0, %v628_v5 }
 0x6ee   : > { %635 = vrot.lane.b32.xlu0 %v1786_v8, %s2291_s15 }
 0x760   : > { %v636_v9 = vpop.permute.xlu0 %635 }
 0x761   : > { %v638_v10 = vmul.f32 %v2137_v4, %v636_v9 }
 0x763   : > { %640 = vrot.lane.b32.xlu1 %v638_v10, %s2292_s16  ;;  %v884_v10 = vstv %s883_s29 }
 0x764   : > { %vm2558_vm8 = vcmp.eq.s32.totalorder %v884_v10, 1 }
 0x7d5   : > { %v641_v15 = vpop.permute.xlu1 %640 }
 0x7d6   : > { %v643_v16 = vadd.f32 %v641_v15, %v633_v14 }
 0x7d8   : > { %2138 = vtanh.f32 %v643_v16  ;;  %v654_v38 = vsel %vm2514_vm6, %v643_v16, %v631_v13 }
 0x7d9   : > { %v747_v39 = vrot.slane %v654_v38, 7 }
 0x7e2   : > { %v2139_v17 = vpop.eup %2138 }
 0x7e3   : > { %646 = vrot.lane.b32.xlu0 %v2139_v17, %s2293_s17 }
 0x855   : > { %v647_v19 = vpop.permute.xlu0 %646 }
 0x856   : > { %v649_v21 = vmul.f32 %v2137_v4, %v647_v19 }
 0x858   : > { %v657_v23 = vsel %vm2514_vm6, %v649_v21, %v655_v20 }
 0x859   : > { %v659_v24 = vrot.slane %v657_v23, 2  ;;  %v771_v46 = vrot.slane %v657_v23, 7 }
 0x85b   : > { %660 = vrot.lane.b32.xlu1 %v659_v24, %s2294_s20 }
 0x8cd   : > { %v661_v25 = vpop.permute.xlu1 %660 }
 0x8ce   : > { %1916 = vmatmul.mubr.msk.f32.vlgmr.msra.gmra.mrb[2].mxu0 %vm317_vm4, %v661_v25 }
 0x8cf   : > { %2026 = vmatpush3.bf16.msra.mxu0 %v2433_v6  ;;  %1933 = vmatprep.mubr.msk.f32.mxu0 %vm2289_vm0, %v2288_v0 }
 0x8d0   : > { %1931 = vmatprep.subr.mxu0 %v2288_v0 }
 0x8d3   : > { %1932 = vmatpush3.msk.msra.mxu0 %vm321_vm2, %v2440_v7 }
 0x8d4   : > { %2030 = vmatprep.subr.bf16.mxu0 %v2290_v1 }
 0x9a1   : > { %v730_v26 = vpop.f32.mrb[2].mxu0 }
 0x9a2   : > { %v735_v27 = vrot.slane %v730_v26, 5  ;;  %v1917_v28 = vpop.f32.mrb[3].mxu0 }
 0x9a4   : > { %v737_v29 = vadd.f32 %v735_v27, %v2460_v11 }
 0x9a6   : > { %v1789_v30 = vmul.f32 -1.442695, %v737_v29 }
 0x9a8   : > { %2140 = vpow2.f32 %v1789_v30 }
 0x9b2   : > { %v2141_v31 = vpop.eup %2140 }
 0x9b3   : > { %v741_v32 = vadd.f32 1.0, %v2141_v31 }
 0x9b5   : > { %2142 = vrcp.f32 %v741_v32 }
 0x9bf   : > { %v2143_v33 = vpop.eup %2142 }
 0x9c0   : > { %v744_v34 = vmul.f32 2.0, %v2143_v33  ;;  %v749_v40 = vmul.f32 %v2143_v33, %v747_v39 }
 0x9c2   : > { %v1790_v35 = vadd.f32 -1.0, %v744_v34 }
 0x9c4   : > { %751 = vrot.lane.b32.xlu0 %v1790_v35, %s2291_s15  ;;  %v1000_v35 = vstv %s999_s9 }
 0x9c5   : > { %vm2580_vm9 = vcmp.eq.s32.totalorder %v1000_v35, 1 }
 0xa36   : > { %v752_v36 = vpop.permute.xlu0 %751 }
 0xa37   : > { %v754_v37 = vmul.f32 %v2143_v33, %v752_v36 }
 0xa39   : > { %756 = vrot.lane.b32.xlu1 %v754_v37, %s2292_s16 }
 0xaab   : > { %v757_v41 = vpop.permute.xlu1 %756 }
 0xaac   : > { %v759_v42 = vadd.f32 %v757_v41, %v749_v40 }
 0xaae   : > { %2144 = vtanh.f32 %v759_v42  ;;  %v770_v2 = vsel %vm2536_vm7, %v759_v42, %v747_v39 }
 0xaaf   : > { %v863_v3 = vrot.slane %v770_v2, 7 }
 0xab8   : > { %v2145_v43 = vpop.eup %2144 }
 0xab9   : > { %762 = vrot.lane.b32.xlu0 %v2145_v43, %s2293_s17 }
 0xb2b   : > { %v763_v45 = vpop.permute.xlu0 %762 }
 0xb2c   : > { %v765_v47 = vmul.f32 %v2143_v33, %v763_v45 }
 0xb2e   : > { %v773_v49 = vsel %vm2536_vm7, %v765_v47, %v771_v46 }
 0xb2f   : > { %v775_v50 = vrot.slane %v773_v49, 3  ;;  %v887_v13 = vrot.slane %v773_v49, 7 }
 0xb31   : > { %776 = vrot.lane.b32.xlu1 %v775_v50, %s2294_s20 }
 0xba3   : > { %v777_v51 = vpop.permute.xlu1 %776 }
 0xba4   : > { %1925 = vmatmul.mubr.msk.f32.vlgmr.msra.gmra.mrb[6].mxu1 %vm317_vm4, %v777_v51 }
 0xba5   : > { %2029 = vmatpush3.bf16.msra.mxu1 %v2433_v6  ;;  %1942 = vmatprep.mubr.msk.f32.mxu1 %vm2289_vm0, %v2288_v0 }
 0xba6   : > { %1940 = vmatprep.subr.mxu1 %v2288_v0 }
 0xba9   : > { %1941 = vmatpush3.msk.msra.mxu1 %vm321_vm2, %v2440_v7 }
 0xbaa   : > { %1954 = vmatprep.subr.mxu1 %v2288_v0 }
 0xc77   : > { %v846_v52 = vpop.f32.mrb[6].mxu1 }
 0xc78   : > { %v851_v53 = vrot.slane %v846_v52, 4  ;;  %v1926_v54 = vpop.f32.mrb[7].mxu1 }
 0xc7a   : > { %v853_v55 = vadd.f32 %v851_v53, %v2460_v11 }
 0xc7c   : > { %v1793_v56 = vmul.f32 -1.442695, %v853_v55 }
 0xc7e   : > { %2146 = vpow2.f32 %v1793_v56 }
 0xc88   : > { %v2147_v57 = vpop.eup %2146 }
 0xc89   : > { %v857_v58 = vadd.f32 1.0, %v2147_v57 }
 0xc8b   : > { %2148 = vrcp.f32 %v857_v58 }
 0xc95   : > { %v2149_v59 = vpop.eup %2148 }
 0xc96   : > { %v860_v60 = vmul.f32 2.0, %v2149_v59  ;;  %v865_v4 = vmul.f32 %v2149_v59, %v863_v3 }
 0xc98   : > { %v1794_v61 = vadd.f32 -1.0, %v860_v60 }
 0xc9a   : > { %867 = vrot.lane.b32.xlu0 %v1794_v61, %s2291_s15  ;;  %v1116_v61 = vstv %s1115_s10 }
 0xc9b   : > { %vm2597_vm10 = vcmp.eq.s32.totalorder %v1116_v61, 1 }
 0xd0c   : > { %v868_v62 = vpop.permute.xlu0 %867 }
 0xd0d   : > { %v870_v63 = vmul.f32 %v2149_v59, %v868_v62 }
 0xd0f   : > { %872 = vrot.lane.b32.xlu1 %v870_v63, %s2292_s16 }
 0xd81   : > { %v873_v5 = vpop.permute.xlu1 %872 }
 0xd82   : > { %v875_v8 = vadd.f32 %v873_v5, %v865_v4 }
 0xd84   : > { %2150 = vtanh.f32 %v875_v8  ;;  %v886_v29 = vsel %vm2558_vm8, %v875_v8, %v863_v3 }
 0xd85   : > { %v979_v30 = vrot.slane %v886_v29, 7  ;;  %v1253_v29 = vld [vmem:[#allocation4 + $0x30] sm:$0xf] }
 0xd8e   : > { %v2151_v9 = vpop.eup %2150 }
 0xd8f   : > { %878 = vrot.lane.b32.xlu0 %v2151_v9, %s2293_s17 }
 0xe01   : > { %v879_v12 = vpop.permute.xlu0 %878 }
 0xe02   : > { %v881_v14 = vmul.f32 %v2149_v59, %v879_v12 }
 0xe04   : > { %v889_v16 = vsel %vm2558_vm8, %v881_v14, %v887_v13 }
 0xe05   : > { %v891_v17 = vrot.slane %v889_v16, 4  ;;  %v1003_v37 = vrot.slane %v889_v16, 7 }
 0xe07   : > { %892 = vrot.lane.b32.xlu1 %v891_v17, %s2294_s20 }
 0xe79   : > { %v893_v18 = vpop.permute.xlu1 %892 }
 0xe7a   : > { %1934 = vmatmul.mubr.msk.f32.vlgmr.msra.gmra.mrb[4].mxu0 %vm317_vm4, %v893_v18 }
 0xe7b   : > { %2032 = vmatpush3.bf16.msra.mxu0 %v2433_v6  ;;  %1951 = vmatprep.mubr.msk.f32.mxu0 %vm2289_vm0, %v2288_v0 }
 0xe7c   : > { %1949 = vmatprep.subr.mxu0 %v2288_v0 }
 0xe7f   : > { %1950 = vmatpush3.msk.msra.mxu0 %vm321_vm2, %v2440_v7 }
 0xe80   : > { %2033 = vmatprep.subr.bf16.mxu0 %v2290_v1 }
 0xf4d   : > { %v962_v19 = vpop.f32.mrb[4].mxu0 }
 0xf4e   : > { %v967_v20 = vrot.slane %v962_v19, 3  ;;  %v1935_v21 = vpop.f32.mrb[5].mxu0 }
 0xf50   : > { %v969_v22 = vadd.f32 %v967_v20, %v2460_v11 }
 0xf52   : > { %v1797_v23 = vmul.f32 -1.442695, %v969_v22  ;;  %v1807_v22 = vld [vmem:[%s230_s14] ss:$0 sm:$0xff] }
 0xf54   : > { %2152 = vpow2.f32 %v1797_v23 }
 0xf5e   : > { %v2153_v24 = vpop.eup %2152 }
 0xf5f   : > { %v973_v25 = vadd.f32 1.0, %v2153_v24 }
 0xf61   : > { %2154 = vrcp.f32 %v973_v25 }
 0xf6b   : > { %v2155_v6 = vpop.eup %2154 }
 0xf6c   : > { %v976_v26 = vmul.f32 2.0, %v2155_v6  ;;  %v981_v31 = vmul.f32 %v2155_v6, %v979_v30 }
 0xf6e   : > { %v1798_v27 = vadd.f32 -1.0, %v976_v26  ;;  %v1251_v26 = vld [vmem:[#allocation4 + $0x20] sm:$0xff] }
 0xf70   : > { %983 = vrot.lane.b32.xlu0 %v1798_v27, %s2291_s15  ;;  %v1252_v27 = vld [vmem:[#allocation4 + $0x28] sm:$0xff] }
 0xfe2   : > { %v984_v28 = vpop.permute.xlu0 %983 }
 0xfe3   : > { %v986_v7 = vmul.f32 %v2155_v6, %v984_v28  ;;  %v1254_v28 = vld [vmem:[#allocation4 + $0x38] sm:$0xff] }
 0xfe5   : > { %988 = vrot.lane.b32.xlu1 %v986_v7, %s2292_s16  ;;  %v2034_v7 = vpack.c.bf16 %v1252_v27, %v1251_v26  ;;  %v1506_v27 = vld [vmem:[%s2715_s4 + $0x3] sm:$0x1] }
0x1057   : > { %v989_v32 = vpop.permute.xlu1 %988 }
0x1058   : > { %v991_v33 = vadd.f32 %v989_v32, %v981_v31 }
0x105a   : > { %2156 = vtanh.f32 %v991_v33  ;;  %v1002_v55 = vsel %vm2580_vm9, %v991_v33, %v979_v30 }
0x105b   : > { %v1095_v56 = vrot.slane %v1002_v55, 7 }
0x1064   : > { %v2157_v34 = vpop.eup %2156 }
0x1065   : > { %994 = vrot.lane.b32.xlu0 %v2157_v34, %s2293_s17 }
0x10d7   : > { %v995_v36 = vpop.permute.xlu0 %994 }
0x10d8   : > { %v997_v38 = vmul.f32 %v2155_v6, %v995_v36  ;;  %v1414_v36 = vld [vmem:[#allocation4 + $0x40] sm:$0xff] }
0x10da   : > { %v1005_v40 = vsel %vm2580_vm9, %v997_v38, %v1003_v37  ;;  %v1415_v37 = vld [vmem:[#allocation4 + $0x48] sm:$0xff] }
0x10db   : > { %v1007_v41 = vrot.slane %v1005_v40, 5  ;;  %v1119_v63 = vrot.slane %v1005_v40, 7  ;;  %v233_v38 = vld [vmem:[%s2428_s12 + $0x8] sm:$0x1] }
0x10dd   : > { %1008 = vrot.lane.b32.xlu1 %v1007_v41, %s2294_s20 }
0x114f   : > { %v1009_v42 = vpop.permute.xlu1 %1008 }
0x1150   : > { %1943 = vmatmul.mubr.msk.f32.vlgmr.msra.gmra.mrb[8].mxu1 %vm317_vm4, %v1009_v42  ;;  %v2037_v42 = vpack.c.bf16 %v1415_v37, %v1414_v36 }
0x1151   : > { %1956 = vmatprep.mubr.msk.f32.mxu1 %vm2289_vm0, %v2288_v0  ;;  %1955 = vmatpush3.msra.mxu1 %v1254_v28 }
0x1152   : > { %2036 = vmatprep.subr.bf16.mxu1 %v2290_v1 }
0x1223   : > { %v1078_v43 = vpop.f32.mrb[8].mxu1 }
0x1224   : > { %v1083_v44 = vrot.slane %v1078_v43, 2  ;;  %v1944_v45 = vpop.f32.mrb[9].mxu1 }
0x1226   : > { %v1085_v46 = vadd.f32 %v1083_v44, %v2460_v11 }
0x1228   : > { %v1801_v47 = vmul.f32 -1.442695, %v1085_v46  ;;  %v1416_v46 = vld [vmem:[#allocation4 + $0x50] sm:$0xff] }
0x122a   : > { %2158 = vpow2.f32 %v1801_v47  ;;  %v1417_v47 = vld [vmem:[#allocation4 + $0x58] sm:$0xff] }
0x1234   : > { %v2159_v48 = vpop.eup %2158 }
0x1235   : > { %v1089_v49 = vadd.f32 1.0, %v2159_v48  ;;  %v2040_v48 = vpack.c.bf16 %v1417_v47, %v1416_v46 }
0x1237   : > { %2160 = vrcp.f32 %v1089_v49  ;;  %v1418_v49 = vld [vmem:[#allocation4 + $0x60] sm:$0xff] }
0x1241   : > { %v2161_v50 = vpop.eup %2160 }
0x1242   : > { %v1092_v51 = vmul.f32 2.0, %v2161_v50  ;;  %v1097_v57 = vmul.f32 %v2161_v50, %v1095_v56 }
0x1244   : > { %v1802_v52 = vadd.f32 -1.0, %v1092_v51 }
0x1246   : > { %1099 = vrot.lane.b32.xlu0 %v1802_v52, %s2291_s15  ;;  %v1420_v52 = vld [vmem:[#allocation4 + $0x70] sm:$0xff] }
0x12b8   : > { %v1100_v53 = vpop.permute.xlu0 %1099 }
0x12b9   : > { %v1102_v54 = vmul.f32 %v2161_v50, %v1100_v53  ;;  %v1421_v53 = vld [vmem:[#allocation4 + $0x78] sm:$0xff] }
0x12bb   : > { %1104 = vrot.lane.b32.xlu1 %v1102_v54, %s2292_s16  ;;  %v2046_v54 = vpack.c.bf16 %v1421_v53, %v1420_v52 }
0x132d   : > { %v1105_v58 = vpop.permute.xlu1 %1104 }
0x132e   : > { %v1107_v59 = vadd.f32 %v1105_v58, %v1097_v57  ;;  %v1407_v58 = vld [vmem:[%s2715_s4 + $0x1] sm:$0x1] }
0x1330   : > { %2162 = vtanh.f32 %v1107_v59 }
0x133a   : > { %v2163_v60 = vpop.eup %2162 }
0x133b   : > { %1110 = vrot.lane.b32.xlu0 %v2163_v60, %s2293_s17 }
0x13ad   : > { %v1111_v62 = vpop.permute.xlu0 %1110 }
0x13ae   : > { %v1113_v2 = vmul.f32 %v2161_v50, %v1111_v62  ;;  %v1419_v50 = vld [vmem:[#allocation4 + $0x68] sm:$0xff]  ;;  %v1409_v62 = vld [vmem:[%s2715_s4 + $0x5] sm:$0x1] }
0x13af   : > { %v2043_v51 = vpack.c.bf16 %v1419_v50, %v1418_v49 }
0x13b0   : > { %v1121_v4 = vsel %vm2597_vm10, %v1113_v2, %v1119_v63 }
0x13b1   : > { %v1123_v5 = vrot.slane %v1121_v4, 6  ;;  %v1234_v34 = vrot.slane %v1121_v4, 7 }
0x13b3   : > { %1124 = vrot.lane.b32.xlu1 %v1123_v5, %s2294_s20  ;;  %v1502_v5 = vld [vmem:[#allocation4 + $0x80] sm:$0xff] }
0x1425   : > { %v1125_v8 = vpop.permute.xlu1 %1124 }
0x1426   : > { %1952 = vmatmul.mubr.msk.f32.vlgmr.msra.gmra.mrb[6].mxu0 %vm317_vm4, %v1125_v8  ;;  %v1503_v8 = vld [vmem:[#allocation4 + $0x88] sm:$0xff] }
0x1427   : > { %1965 = vmatprep.mubr.msk.f32.mxu0 %vm2289_vm0, %v2288_v0  ;;  %2035 = vmatpush3.bf16.msra.mxu0 %v2034_v7 }
0x1428   : > { %1963 = vmatprep.subr.mxu0 %v2288_v0 }
0x142b   : > { %1964 = vmatpush3.msk.msra.mxu0 %vm321_vm2, %v1253_v29 }
0x142c   : > { %2048 = vmatprep.subr.bf16.mxu0 %v2290_v1 }
0x14f9   : > { %v1194_v9 = vpop.f32.mrb[6].mxu0 }
0x14fa   : > { %v1199_v10 = vrot.slane %v1194_v9, 1  ;;  %v1953_v12 = vpop.f32.mrb[7].mxu0  ;;  %v2049_v9 = vpack.c.bf16 %v1503_v8, %v1502_v5 }
0x14fb   : > { %v1505_v12 = vld [vmem:[#allocation4 + $0x98] sm:$0xff] }
0x14fc   : > { %v1201_v13 = vadd.f32 %v1199_v10, %v2460_v11  ;;  %v1118_v11 = vsel %vm2597_vm10, %v1107_v59, %v1095_v56  ;;  %v1504_v10 = vld [vmem:[#allocation4 + $0x90] sm:$0xff] }
0x14fd   : > { %v1211_v23 = vrot.slane %v1118_v11, 7  ;;  %v1586_v11 = vld [vmem:[#allocation4 + $0xa0] sm:$0xff] }
0x14fe   : > { %v1805_v14 = vmul.f32 -1.442695, %v1201_v13  ;;  %v2052_v13 = vpack.c.bf16 %v1505_v12, %v1504_v10 }
0x1500   : > { %2164 = vpow2.f32 %v1805_v14  ;;  %v1422_v14 = vld [vmem:[%s2715_s4 + $0x2] sm:$0x1] }
0x150a   : > { %v2165_v15 = vpop.eup %2164 }
0x150b   : > { %v1205_v16 = vadd.f32 1.0, %v2165_v15 }
0x150d   : > { %2166 = vrcp.f32 %v1205_v16 }
0x1517   : > { %v2167_v17 = vpop.eup %2166 }
0x1518   : > { %v1208_v18 = vmul.f32 2.0, %v2167_v17  ;;  %v1213_v24 = vmul.f32 %v2167_v17, %v1211_v23  ;;  %v1587_v23 = vld [vmem:[#allocation4 + $0xa8] sm:$0xff] }
0x151a   : > { %v1806_v19 = vadd.f32 -1.0, %v1208_v18  ;;  %v1497_v18 = vld [vmem:[%s2715_s4 + $0x6] sm:$0x1] }
0x151c   : > { %1215 = vrot.lane.b32.xlu0 %v1806_v19, %s2291_s15  ;;  %s1231_s15 = scalar_select %p1230_p12, 1, 0 }
0x151e   : > { %v1232_v31 = vstv %s1231_s15 }
0x151f   : > { %vm1233_vm11 = vcmp.eq.s32.totalorder %v1232_v31, 1 }
0x158e   : > { %v1216_v20 = vpop.permute.xlu0 %1215 }
0x158f   : > { %v1218_v21 = vmul.f32 %v2167_v17, %v1216_v20 }
0x1591   : > { %1220 = vrot.lane.b32.xlu1 %v1218_v21, %s2292_s16 }
0x1595   : > { %1243 = vrot.lane.b32.xlu1 %v1807_v22, %s2295_s19  ;;  %s221_s19 = sand.u32 1, %s2274_s24  }
0x1596   : > { %s222_s15 = scalar_lea.vmem [#allocation7], %s221_s19 }
0x1597   : > { %s1690_s12 = sshll.u32 %s222_s15, 4  ;;  %s2670_s12 = int_to_ptr.vmem [resolvable:$true] %s1690_s12 }
0x1598   : > { %s2214_s21 = scalar_lea.vmem %s2670_s12, 16 }
0x1599   : > { %p2215_p13 = scmp.ne.s32.totalorder %s2670_s12, %s2214_s21 }
0x159b   : > { %p2216_p4 = pnand %p2215_p13, %p2741_p2 }
0x159d   : > { %p2217_p6 = pneg %p2216_p4 }
0x1603   : > { %v1221_v25 = vpop.permute.xlu1 %1220 }
0x1604   : > { %v1223_v6 = vadd.f32 %v1221_v25, %v1213_v24  ;;  %v2055_v24 = vpack.c.bf16 %v1587_v23, %v1586_v11  ;;  %v1588_v25 = vld [vmem:[#allocation4 + $0xb0] sm:$0xff] }
0x1606   : > { %2168 = vtanh.f32 %v1223_v6  ;;  %v1589_v6 = vld [vmem:[#allocation4 + $0xb8] sm:$0xff] }
0x1607   : > { %v1244_v35 = vpop.permute.xlu1 %1243  ;;  %v2058_v26 = vpack.c.bf16 %v1589_v6, %v1588_v25 }
0x1610   : > { %v2169_v30 = vpop.eup %2168 }
0x1611   : > { %1226 = vrot.lane.b32.xlu0 %v2169_v30, %s2293_s17 }
0x1615   : > { %1247 = vrot.lane.b32.xlu0 %v1807_v22, %s2296_s30  ;;  %s1814_s30 = sshll.u32 %s2352_s26, 4  ;;  %s2297_s26 = smov [#allocation7]  }
0x1616   : > { %s2668_s18 = scalar_lea.hbm %s2716_s5, %s1814_s30  ;;  %s2218_s22 = sshll.u32 %s2297_s26, 4  ;;  %s2219_s22 = int_to_ptr.vmem [resolvable:$false] %s2218_s22 }
0x1617   : > { %s2220_s27 = scalar_lea.vmem %s2219_s22, 32  ;;  %p2221_p5 = scmp.lt.s32.totalorder %s2670_s12, %s2219_s22 }
0x1618   : > { %p2222_p10 = scmp.lt.s32.totalorder %s2220_s27, %s2214_s21 }
0x161a   : > { %p2223_p11 = por %p2222_p10, %p2221_p5 }
0x161c   : > { %p2224_p0 = pnand %p2223_p11, %p2217_p6 }
0x1683   : > { %v1227_v32 = vpop.permute.xlu0 %1226 }
0x1684   : > { %v1229_v33 = vmul.f32 %v2167_v17, %v1227_v32 }
0x1686   : > { %v1236_v39 = vsel %vm1233_vm11, %v1229_v33, %v1234_v34 }
0x1687   : > { %v1246_v40 = vmul.f32 %v1244_v35, %v1236_v39  ;;  %v1248_v41 = vpop.permute.xlu0 %1247 }
0x1688   : > { %v1250_v43 = vmul.f32 %v1248_v41, %v233_v38 }
0x1689   : > { %v1329_v44 = vrot.slane %v1246_v40, 7 }
0x168a   : > { %1957 = vmatmul.mubr.msk.f32.vlgmr.msra.gmra.mrb[10].mxu1 %vm243_vm1, %v1250_v43 }
0x168b   : > { %1330 = vrot.lane.b32.xlu1 %v1329_v44, %s2294_s20  ;;  %2038 = vmatpush3.bf16.msra.mxu1 %v2037_v42  ;;  %s1678_s20 = scalar_lea.sflag [#allocation6], %s221_s19 }
0x168c   : > { %2039 = vmatprep.subr.bf16.mxu1 %v2290_v1  ;;  %1984 = vmatprep.mubr.msk.f32.mxu1 %vm2289_vm0, %v2288_v0 }
0x168f   : > { %2041 = vmatpush3.bf16.msra.mxu1 %v2040_v48 }
0x1690   : > { %2042 = vmatprep.subr.bf16.mxu1 %v2290_v1 }
0x1693   : > { %2044 = vmatpush3.bf16.msra.mxu1 %v2043_v51 }
0x1694   : > { %2045 = vmatprep.subr.bf16.mxu1 %v2290_v1 }
0x1697   : > { %2047 = vmatpush3.bf16.msra.mxu1 %v2046_v54 }
0x16fd   : > { %v1331_v45 = vpop.permute.xlu1 %1330 }
0x16fe   : > { %1966 = vmatmul.mubr.msk.f32.vlgmr.msra.gmra.mrb[8].mxu0 %vm317_vm4, %v1331_v45 }
0x16ff   : > { %1995 = vmatprep.mubr.msk.f32.mxu0 %vm2289_vm0, %v2288_v0  ;;  %2050 = vmatpush3.bf16.msra.mxu0 %v2049_v9 }
0x1700   : > { %2051 = vmatprep.subr.bf16.mxu0 %v2290_v1 }
0x1703   : > { %2053 = vmatpush3.bf16.msra.mxu0 %v2052_v13 }
0x1704   : > { %2054 = vmatprep.subr.bf16.mxu0 %v2290_v1 }
0x175d   : > { %v1324_v55 = vpop.f32.mrb[10].mxu1 }
0x175e   : > { %v1958_v56 = vpop.f32.mrb[11].mxu1 }
0x17d1   : > { %v1403_v57 = vpop.f32.mrb[8].mxu0 }
0x17d2   : > { %v1404_v59 = vadd.f32 %v1403_v57, %v1324_v55  ;;  %v1967_v60 = vpop.f32.mrb[9].mxu0 }
0x17d4   : > { %v1408_v61 = vadd.f32 %v1407_v58, %v1404_v59 }
0x17d6   : > { %v1411_v63 = vmin.f32 %v1408_v61, 0.0  ;;  %v1410_v2 = vmax.f32 %v1408_v61, 0.0 }
0x17d8   : > { %v1412_v3 = vmul.f32 %v1411_v63, %v1409_v62 }
0x17da   : > { %v1413_v4 = vadd.f32 %v1412_v3, %v1410_v2 }
0x17dc   : > { %1985 = vmatmul.mubr.msk.f32.vlgmr.msra.gmra.mrb[12].mxu1 %vm1423_vm12, %v1413_v4 }
0x18af   : > { %v1493_v15 = vpop.f32.mrb[12].mxu1 }
0x18b0   : > { %v1494_v16 = vadd.f32 %v1493_v15, %v1422_v14  ;;  %v1986_v17 = vpop.f32.mrb[13].mxu1 }
0x18b2   : > { %v1499_v19 = vmin.f32 %v1494_v16, 0.0  ;;  %v1498_v20 = vmax.f32 %v1494_v16, 0.0 }
0x18b4   : > { %v1500_v21 = vmul.f32 %v1499_v19, %v1497_v18 }
0x18b6   : > { %v1501_v22 = vadd.f32 %v1500_v21, %v1498_v20 }
0x18b8   : > { %1996 = vmatmul.mubr.msk.f32.vlgmr.msra.gmra.mrb[10].mxu0 %vm1507_vm13, %v1501_v22 }
0x18b9   : > { %2006 = vmatprep.mubr.msk.f32.mxu0 %vm2289_vm0, %v2288_v0  ;;  %2056 = vmatpush3.bf16.msra.mxu0 %v2055_v24  ;;  %v1581_v0 = vld [vmem:[%s2715_s4 + $0x7] sm:$0x1] }
0x18ba   : > { %2057 = vmatprep.subr.bf16.mxu0 %v2290_v1  ;;  %v1590_v1 = vld [vmem:[%s2715_s4 + $0x4] sm:$0x1] }
0x18bd   : > { %2059 = vmatpush3.bf16.msra.mxu0 %v2058_v26 }
0x198b   : > { %v1577_v28 = vpop.f32.mrb[10].mxu0 }
0x198c   : > { %v1578_v7 = vadd.f32 %v1577_v28, %v1506_v27  ;;  %v1997_v29 = vpop.f32.mrb[11].mxu0 }
0x198e   : > { %v1583_v30 = vmin.f32 %v1578_v7, 0.0  ;;  %v1582_v31 = vmax.f32 %v1578_v7, 0.0 }
0x1990   : > { %v1584_v32 = vmul.f32 %v1583_v30, %v1581_v0 }
0x1992   : > { %v1585_v33 = vadd.f32 %v1584_v32, %v1582_v31 }
0x1994   : > { %2007 = vmatmul.mubr.msk.f32.vlgmr.msra.gmra.mrb[12].mxu0 %vm1507_vm13, %v1585_v33 }
0x1a67   : > { %v1660_v34 = vpop.f32.mrb[12].mxu0 }
0x1a68   : > { %v1661_v35 = vadd.f32 %v1660_v34, %v1590_v1  ;;  %v2008_v36 = vpop.f32.mrb[13].mxu0 }
0x1a6a   : > { %v1665_v37 = vsel %vm1664_vm14, %v1661_v35, -inf }
0x1a6b   : > { %1666 = vmax.xlane.f32.xlu0 %v1665_v37 }
0x1af8   : > { %v1667_v38 = vpop.xlane.xlu0 %1666 }
0x1af9   : > { %v1668_v39 = vsub.f32 %v1661_v35, %v1667_v38 }
0x1afb   : > { %v1669_v40 = vmul.f32 1.442695, %v1668_v39 }
0x1afd   : > { %2170 = vpow2.f32 %v1669_v40 }
0x1b07   : > { %v2171_v41 = vpop.eup %2170 }
0x1b08   : > { %v1671_v42 = vsel %vm1664_vm14, %v2171_v41, 0.0 }
0x1b09   : > { %1672 = vadd.xlane.f32.xlu1 %v1671_v42 }
0x1b96   : > { %v1673_v43 = vpop.xlane.xlu1 %1672 }
0x1b97   : > { %2172 = vrcp.f32 %v1673_v43 }
0x1ba1   : > { %v2173_v44 = vpop.eup %2172 }
0x1ba2   : > { %v1675_v45 = vmul.f32 %v2173_v44, %v2171_v41 }
0x1ba4   : > { %1676 = vst.msk [vmem:[%s222_s15] sm:$0x1] %vm1664_vm14, %v1675_v45 }
0x1ba5   : > { %2227 = shalt.err (!%p2224_p0)
}
0x1ba6   : > { %s2228_s29 = scalar_lea.hbm %s2668_s18, 16  ;;  %s2232_s11 = scalar_lea.hbm %s2716_s5, 32 }
0x1ba7   : > { %p2229_p1 = scmp.ne.s32.totalorder %s2668_s18, %s2228_s29  ;;  %p2233_p8 = scmp.lt.u32.totalorder %s2668_s18, %s2716_s5 }
0x1ba8   : > { %p2234_p9 = scmp.lt.u32.totalorder %s2232_s11, %s2228_s29  ;;  %p2236_p13 = scmp.lt.u32.totalorder %s2228_s29, %s2668_s18 }
0x1ba9   : > { %p2230_p3 = pnand %p2229_p1, %p2741_p2 }
0x1baa   : > { %p2235_p12 = por %p2234_p9, %p2233_p8 }
0x1bab   : > { %p2231_p7 = pneg %p2230_p3 }
0x1bac   : > { %p2237_p4 = por %p2236_p13, %p2235_p12 }
0x1bae   : > { %p2238_p6 = pnand %p2237_p4, %p2231_p7 }
0x1bb0   : > { %2241 = shalt.err (!%p2238_p6)
}
0x1bb1   : > { %2064 = dma.vmem_to_hbm [thread:$0]  (%p2741_p2), %s2670_s12, 16, %s2668_s18, %s1678_s20  }
0x1bb2 PF: > { %p2076_p5 = scmp.ge.s32.totalorder %s2282_s25, 2  ;;  %s1702_s19 = sand.u32 1, %s2270_s23  }
0x1bb3   : > { %p2742_p10 = scmp.ne.s32.totalorder %s2721_s8, 0  ;;  %s1703_s30 = scalar_lea.sflag [#allocation6], %s1702_s19 }
0x1bb5   : > { %p2071_p11 = pnand %p2076_p5, %p2742_p10 }
0x1bb7   : > { %2265 = dma.done.wait (!%p2071_p11), %s1703_s30, 16  }
0x1bb8   : > { %2267 = vsyncadd (!%p2071_p11), %s1703_s30, 4294967280  ;;  %p22_p0 = scmp.ge.s32.totalorder %s2356_s28, 4   ;;  %s2743_s23 = smov %s2274_s24 }
0x1bb9   : > { %s2744_s24 = smov %s2278_s0  ;;  %s2745_s0 = smov %s2367_s6 }
0x1bba   : > { %s2746_s25 = smov %s2356_s28  ;;  %24 = sbr.rel (!%p22_p0) target bundleno = 19 (0x13), region = 79 }
0x1bc1   :  { %1707 = vsyncpa [#allocation5], 1 }
0x1bc2   :  { %1709 = vsyncpa [#allocation5 + $0x1], 1 }
0x1bc3   :  { %1710 = vsyncpa [#allocation6], 1 }
0x1bc4   :  { %1712 = vsyncpa [#allocation6 + $0x1], 1 }

</bundles_post_ra>
